<compile_context>
chip_gen: v5e
topology: v5e:2x2
jax: 0.10.0
libtpu: 0.0.40
codegen_flags: <defaults>
</compile_context>

<pallas_src>
import jax
import jax.numpy as jnp
from jax.experimental import pallas as pl
from jax.experimental.pallas import tpu as pltpu

KH, KW = 4, 4
C_OUT = 4
C_IN = 1


def _round_up(x, m):
    return ((x + m - 1) // m) * m


def _default_bt():
    """Per-generation batch-tile default (review: 64 v5e / 128 v6e / 256 v7x)."""
    try:
        kind = jax.devices()[0].device_kind.lower()
    except Exception:
        return 128
    if "v5" in kind:
        return 64
    if "v6" in kind:
        return 128
    if "v7" in kind or "7x" in kind:
        return 256
    return 128


def _pick_bt(n, hint):
    """Pick the batch tile: multiple of 8, grid >= 2 when possible, prefer a
    tile that divides n so no padded images are written."""
    if n <= 8:
        return n                       # whole (tiny) batch in one step
    cap = min(hint, max(8, -(-n // 2)))    # keep at least 2 grid steps
    cap = max(8, (cap // 8) * 8)           # multiple of 8 sublanes
    lo = max(8, (cap // 2 // 8) * 8)
    for cand in range(cap, lo - 1, -8):    # prefer a divisor of n near cap
        if n % cand == 0:
            return cand
    return cap


def _make_network_kernel(W, Lpad, PM, PPpad, Bt, sub, n_sub):
    """Kernel body, closed over static geometry.

    W     : input image width (flat row stride)
    Lpad  : per-channel lane-dense flat conv length (multiple of 128)
    PM    : flat 2x2-window-max length (multiple of 8)
    PPpad : per-channel lane-dense pooled length (multiple of 128)
    Bt    : images per grid step; sub / n_sub: in-kernel batch sub-tiling
    """
    KK = KH * KW

    def kernel(x_ref, w_ref, st_ref, conv_ref, relu_ref, pool_ref, pm_sc):
        # x_ref   : (Bt, Lin)          VMEM  zero-padded flat input images
        # w_ref   : (C_OUT*KH*KW,)     SMEM  conv weights (scalar reads)
        # st_ref  : (PM, PPpad)        VMEM  one-hot stride-2 selection matrix
        # conv_ref: (Bt, C_OUT*Lpad)   VMEM  lane-dense conv output
        # relu_ref: (Bt, C_OUT*Lpad)   VMEM  lane-dense relu output
        # pool_ref: (Bt, C_OUT*PPpad)  VMEM  lane-dense pooled output
        # pm_sc   : (C_OUT, Bt, PM)    VMEM  window-max staging buffer

        def process(row0):
            xf = x_ref[pl.ds(row0, sub), :]                      # (sub, Lin)
            # 16 shifted flat views, hoisted out of the channel loop
            # (16 unaligned slices per sub-tile instead of 64).
            shifts = [xf[:, kh * W + kw: kh * W + kw + Lpad]
                      for kh in range(KH) for kw in range(KW)]   # (sub, Lpad)
            for c in range(C_OUT):
                # "valid" conv, stride 1, no bias: shifted MAC w/ SMEM scalars.
                acc = shifts[0] * w_ref[c * KK]
                for t in range(1, KK):
                    acc = acc + shifts[t] * w_ref[c * KK + t]
                conv_ref[pl.ds(row0, sub), c * Lpad:(c + 1) * Lpad] = acc
                r = jnp.maximum(acc, 0.0)                        # ReLU
                relu_ref[pl.ds(row0, sub), c * Lpad:(c + 1) * Lpad] = r
                # MaxPool2d(2,2): 2x2 window max in flat coordinates (VPU).
                pm = jnp.maximum(
                    jnp.maximum(r[:, 0:PM], r[:, 1:PM + 1]),
                    jnp.maximum(r[:, W:W + PM], r[:, W + 1:W + 1 + PM]))
                pm_sc[c, pl.ds(row0, sub), :] = pm

        if n_sub == 1:
            process(0)
        else:
            @pl.loop(0, n_sub)
            def _(s):
                process(pl.multiple_of(s * sub, sub))

        # Exact stride-2 down-sample: ONE one-hot selection matmul per grid
        # step, batched over all channels and all images of the step.
        pooled = jnp.dot(pm_sc[...].reshape(C_OUT * Bt, PM), st_ref[...],
                         preferred_element_type=jnp.float32)
        pooled = pooled.reshape(C_OUT, Bt, PPpad)
        for c in range(C_OUT):
            pool_ref[:, c * PPpad:(c + 1) * PPpad] = pooled[c]

    return kernel


def network_forward(x, weights, *, bt=None):
    """x: (N, 1, H, W) f32, weights: (4, 1, 4, 4) f32 -> (conv, relu, pool) NCHW."""
    N, Cin, H, W = x.shape
    assert Cin == C_IN
    Ho, Wo = H - KH + 1, W - KW + 1
    Hp, Wp = Ho // 2, Wo // 2
    PP = Hp * Wp

    Lpad = _round_up(Ho * W, 128)                 # lane-dense flat conv length
    max_off = (KH - 1) * W + (KW - 1)             # largest shift offset
    Lin = _round_up(max_off + Lpad, 128)          # zero-padded flat input len
    PM = _round_up(2 * (Hp - 1) * W + 2 * (Wp - 1) + 1, 8)
    PPpad = _round_up(PP, 128)
    assert W + 1 + PM <= Lpad

    if bt is None:
        bt = _default_bt()
    Bt = _pick_bt(N, int(bt))
    sub = Bt if Bt < 8 else 8
    n_sub = Bt // sub
    Npad = pl.cdiv(N, Bt) * Bt

    # Flatten images; pad batch to Npad and lanes to Lin with zeros.
    xf = x.reshape(N, H * W).astype(jnp.float32)
    xf = jnp.pad(xf, ((0, Npad - N), (0, Lin - H * W)))

    w_flat = weights.reshape(-1).astype(jnp.float32)       # (C_OUT*KH*KW,)

    # One-hot stride-2 selection matrix (host-built, resident across steps):
    #   st[q, p] = 1  iff  p < PP and q == 2*(p//Wp)*W + 2*(p%Wp)
    q_idx = jax.lax.broadcasted_iota(jnp.int32, (PM, PPpad), 0)
    p_idx = jax.lax.broadcasted_iota(jnp.int32, (PM, PPpad), 1)
    st = jnp.where(
        (p_idx < PP) & (q_idx == 2 * (p_idx // Wp) * W + 2 * (p_idx % Wp)),
        jnp.float32(1.0), jnp.float32(0.0))

    out_shapes = (
        jax.ShapeDtypeStruct((Npad, C_OUT * Lpad), jnp.float32),
        jax.ShapeDtypeStruct((Npad, C_OUT * Lpad), jnp.float32),
        jax.ShapeDtypeStruct((Npad, C_OUT * PPpad), jnp.float32),
    )
    conv_f, relu_f, pool_f = pl.pallas_call(
        _make_network_kernel(W, Lpad, PM, PPpad, Bt, sub, n_sub),
        out_shape=out_shapes,
        grid=(Npad // Bt,),
        in_specs=[
            pl.BlockSpec((Bt, Lin), lambda b: (b, 0)),
            pl.BlockSpec(memory_space=pltpu.MemorySpace.SMEM),
            pl.BlockSpec((PM, PPpad), lambda b: (0, 0)),   # resident block
        ],
        out_specs=(
            pl.BlockSpec((Bt, C_OUT * Lpad), lambda b: (b, 0)),
            pl.BlockSpec((Bt, C_OUT * Lpad), lambda b: (b, 0)),
            pl.BlockSpec((Bt, C_OUT * PPpad), lambda b: (b, 0)),
        ),
        scratch_shapes=[pltpu.VMEM((C_OUT, Bt, PM), jnp.float32)],
        compiler_params=pltpu.CompilerParams(
            dimension_semantics=("parallel",)),   # batch axis is independent
    )(xf, w_flat, st)

    # Lane-dense flat -> NCHW: reshape + one slice (no extra pad pass).
    def unflatten(a):
        a = a[:N].reshape(N, C_OUT, Lpad)
        if Lpad % W == 0:
            return a.reshape(N, C_OUT, Lpad // W, W)[:, :, :Ho, :Wo]
        return a[:, :, :Ho * W].reshape(N, C_OUT, Ho, W)[..., :Wo]

    conv = unflatten(conv_f)
    relu = unflatten(relu_f)
    pool = (pool_f[:N].reshape(N, C_OUT, PPpad)[:, :, :PP]
            .reshape(N, C_OUT, Hp, Wp))
    return conv, relu, pool


if __name__ == "__main__":
    key = jax.random.PRNGKey(0)
    kx, kw = jax.random.split(key)
    x = jax.random.normal(kx, (2, 1, 16, 16), dtype=jnp.float32)
    weights = jax.random.normal(kw, (C_OUT, 1, KH, KW), dtype=jnp.float32)

    conv, relu, pooled = jax.block_until_ready(
        jax.jit(network_forward)(x, weights))

    # Plain-JAX reference for a sanity check.
    conv_ref = jax.lax.conv_general_dilated(
        x, weights, window_strides=(1, 1), padding="VALID",
        dimension_numbers=("NCHW", "OIHW", "NCHW"))
    relu_ref = jnp.maximum(conv_ref, 0.0)
    pool_ref = jax.lax.reduce_window(
        relu_ref, -jnp.inf, jax.lax.max,
        window_dimensions=(1, 1, 2, 2), window_strides=(1, 1, 2, 2),
        padding="VALID")

    assert conv.shape == (2, C_OUT, 13, 13)
    assert relu.shape == (2, C_OUT, 13, 13)
    assert pooled.shape == (2, C_OUT, 6, 6)
    assert jnp.allclose(conv, conv_ref, atol=1e-4, rtol=1e-4)
    assert jnp.allclose(relu, relu_ref, atol=1e-4, rtol=1e-4)
    assert jnp.allclose(pooled, pool_ref, atol=1e-4, rtol=1e-4)
    print("KERNEL_OK")
</pallas_src>

<mosaic_0001>
module attributes {stable_mosaic.version = 11 : i64} {
  func.func @kernel(%arg0: i32, %arg1: memref<2x384xf32, #tpu.memory_space<vmem>>, %arg2: memref<64xf32, #tpu.memory_space<smem>>, %arg3: memref<176x128xf32, #tpu.memory_space<vmem>>, %arg4: memref<2x1024xf32, #tpu.memory_space<vmem>>, %arg5: memref<2x1024xf32, #tpu.memory_space<vmem>>, %arg6: memref<2x512xf32, #tpu.memory_space<vmem>>, %arg7: memref<4x2x176xf32, #tpu.memory_space<vmem>>) attributes {dimension_semantics = [#tpu.dimension_semantics<parallel>], iteration_bounds = array<i64: 1>, scalar_prefetch = 0 : i64, scratch_operands = 1 : i64, tpu.core_type = #tpu.core_type<tc>, window_params = [{transform_indices = @transform_0, window_bounds = array<i64: 2, 384>}, {transform_indices = @transform_1, window_bounds = array<i64: 64>}, {pipeline_mode = #tpu.pipeline_mode<synchronous>, transform_indices = @transform_2, window_bounds = array<i64: 176, 128>}, {transform_indices = @transform_3, window_bounds = array<i64: 2, 1024>}, {transform_indices = @transform_4, window_bounds = array<i64: 2, 1024>}, {transform_indices = @transform_5, window_bounds = array<i64: 2, 512>}]} {
    %c0 = arith.constant 0 : index
    %c0_0 = arith.constant 0 : index
    %0 = vector.load %arg1[%c0, %c0_0] : memref<2x384xf32, #tpu.memory_space<vmem>>, vector<2x384xf32>
    %1 = vector.extract_strided_slice %0 {offsets = [0, 0], sizes = [2, 256], strides = [1, 1]} : vector<2x384xf32> to vector<2x256xf32>
    %2 = vector.extract_strided_slice %0 {offsets = [0, 1], sizes = [2, 256], strides = [1, 1]} : vector<2x384xf32> to vector<2x256xf32>
    %3 = vector.extract_strided_slice %0 {offsets = [0, 2], sizes = [2, 256], strides = [1, 1]} : vector<2x384xf32> to vector<2x256xf32>
    %4 = vector.extract_strided_slice %0 {offsets = [0, 3], sizes = [2, 256], strides = [1, 1]} : vector<2x384xf32> to vector<2x256xf32>
    %5 = vector.extract_strided_slice %0 {offsets = [0, 16], sizes = [2, 256], strides = [1, 1]} : vector<2x384xf32> to vector<2x256xf32>
    %6 = vector.extract_strided_slice %0 {offsets = [0, 17], sizes = [2, 256], strides = [1, 1]} : vector<2x384xf32> to vector<2x256xf32>
    %7 = vector.extract_strided_slice %0 {offsets = [0, 18], sizes = [2, 256], strides = [1, 1]} : vector<2x384xf32> to vector<2x256xf32>
    %8 = vector.extract_strided_slice %0 {offsets = [0, 19], sizes = [2, 256], strides = [1, 1]} : vector<2x384xf32> to vector<2x256xf32>
    %9 = vector.extract_strided_slice %0 {offsets = [0, 32], sizes = [2, 256], strides = [1, 1]} : vector<2x384xf32> to vector<2x256xf32>
    %10 = vector.extract_strided_slice %0 {offsets = [0, 33], sizes = [2, 256], strides = [1, 1]} : vector<2x384xf32> to vector<2x256xf32>
    %11 = vector.extract_strided_slice %0 {offsets = [0, 34], sizes = [2, 256], strides = [1, 1]} : vector<2x384xf32> to vector<2x256xf32>
    %12 = vector.extract_strided_slice %0 {offsets = [0, 35], sizes = [2, 256], strides = [1, 1]} : vector<2x384xf32> to vector<2x256xf32>
    %13 = vector.extract_strided_slice %0 {offsets = [0, 48], sizes = [2, 256], strides = [1, 1]} : vector<2x384xf32> to vector<2x256xf32>
    %14 = vector.extract_strided_slice %0 {offsets = [0, 49], sizes = [2, 256], strides = [1, 1]} : vector<2x384xf32> to vector<2x256xf32>
    %15 = vector.extract_strided_slice %0 {offsets = [0, 50], sizes = [2, 256], strides = [1, 1]} : vector<2x384xf32> to vector<2x256xf32>
    %16 = vector.extract_strided_slice %0 {offsets = [0, 51], sizes = [2, 256], strides = [1, 1]} : vector<2x384xf32> to vector<2x256xf32>
    %c0_1 = arith.constant 0 : index
    %17 = memref.load %arg2[%c0_1] : memref<64xf32, #tpu.memory_space<smem>>
    %18 = vector.broadcast %17 : f32 to vector<2x256xf32>
    %19 = arith.mulf %1, %18 : vector<2x256xf32>
    %c1 = arith.constant 1 : index
    %20 = memref.load %arg2[%c1] : memref<64xf32, #tpu.memory_space<smem>>
    %21 = vector.broadcast %20 : f32 to vector<2x256xf32>
    %22 = arith.mulf %2, %21 : vector<2x256xf32>
    %23 = arith.addf %19, %22 : vector<2x256xf32>
    %c2 = arith.constant 2 : index
    %24 = memref.load %arg2[%c2] : memref<64xf32, #tpu.memory_space<smem>>
    %25 = vector.broadcast %24 : f32 to vector<2x256xf32>
    %26 = arith.mulf %3, %25 : vector<2x256xf32>
    %27 = arith.addf %23, %26 : vector<2x256xf32>
    %c3 = arith.constant 3 : index
    %28 = memref.load %arg2[%c3] : memref<64xf32, #tpu.memory_space<smem>>
    %29 = vector.broadcast %28 : f32 to vector<2x256xf32>
    %30 = arith.mulf %4, %29 : vector<2x256xf32>
    %31 = arith.addf %27, %30 : vector<2x256xf32>
    %c4 = arith.constant 4 : index
    %32 = memref.load %arg2[%c4] : memref<64xf32, #tpu.memory_space<smem>>
    %33 = vector.broadcast %32 : f32 to vector<2x256xf32>
    %34 = arith.mulf %5, %33 : vector<2x256xf32>
    %35 = arith.addf %31, %34 : vector<2x256xf32>
    %c5 = arith.constant 5 : index
    %36 = memref.load %arg2[%c5] : memref<64xf32, #tpu.memory_space<smem>>
    %37 = vector.broadcast %36 : f32 to vector<2x256xf32>
    %38 = arith.mulf %6, %37 : vector<2x256xf32>
    %39 = arith.addf %35, %38 : vector<2x256xf32>
    %c6 = arith.constant 6 : index
    %40 = memref.load %arg2[%c6] : memref<64xf32, #tpu.memory_space<smem>>
    %41 = vector.broadcast %40 : f32 to vector<2x256xf32>
    %42 = arith.mulf %7, %41 : vector<2x256xf32>
    %43 = arith.addf %39, %42 : vector<2x256xf32>
    %c7 = arith.constant 7 : index
    %44 = memref.load %arg2[%c7] : memref<64xf32, #tpu.memory_space<smem>>
    %45 = vector.broadcast %44 : f32 to vector<2x256xf32>
    %46 = arith.mulf %8, %45 : vector<2x256xf32>
    %47 = arith.addf %43, %46 : vector<2x256xf32>
    %c8 = arith.constant 8 : index
    %48 = memref.load %arg2[%c8] : memref<64xf32, #tpu.memory_space<smem>>
    %49 = vector.broadcast %48 : f32 to vector<2x256xf32>
    %50 = arith.mulf %9, %49 : vector<2x256xf32>
    %51 = arith.addf %47, %50 : vector<2x256xf32>
    %c9 = arith.constant 9 : index
    %52 = memref.load %arg2[%c9] : memref<64xf32, #tpu.memory_space<smem>>
    %53 = vector.broadcast %52 : f32 to vector<2x256xf32>
    %54 = arith.mulf %10, %53 : vector<2x256xf32>
    %55 = arith.addf %51, %54 : vector<2x256xf32>
    %c10 = arith.constant 10 : index
    %56 = memref.load %arg2[%c10] : memref<64xf32, #tpu.memory_space<smem>>
    %57 = vector.broadcast %56 : f32 to vector<2x256xf32>
    %58 = arith.mulf %11, %57 : vector<2x256xf32>
    %59 = arith.addf %55, %58 : vector<2x256xf32>
    %c11 = arith.constant 11 : index
    %60 = memref.load %arg2[%c11] : memref<64xf32, #tpu.memory_space<smem>>
    %61 = vector.broadcast %60 : f32 to vector<2x256xf32>
    %62 = arith.mulf %12, %61 : vector<2x256xf32>
    %63 = arith.addf %59, %62 : vector<2x256xf32>
    %c12 = arith.constant 12 : index
    %64 = memref.load %arg2[%c12] : memref<64xf32, #tpu.memory_space<smem>>
    %65 = vector.broadcast %64 : f32 to vector<2x256xf32>
    %66 = arith.mulf %13, %65 : vector<2x256xf32>
    %67 = arith.addf %63, %66 : vector<2x256xf32>
    %c13 = arith.constant 13 : index
    %68 = memref.load %arg2[%c13] : memref<64xf32, #tpu.memory_space<smem>>
    %69 = vector.broadcast %68 : f32 to vector<2x256xf32>
    %70 = arith.mulf %14, %69 : vector<2x256xf32>
    %71 = arith.addf %67, %70 : vector<2x256xf32>
    %c14 = arith.constant 14 : index
    %72 = memref.load %arg2[%c14] : memref<64xf32, #tpu.memory_space<smem>>
    %73 = vector.broadcast %72 : f32 to vector<2x256xf32>
    %74 = arith.mulf %15, %73 : vector<2x256xf32>
    %75 = arith.addf %71, %74 : vector<2x256xf32>
    %c15 = arith.constant 15 : index
    %76 = memref.load %arg2[%c15] : memref<64xf32, #tpu.memory_space<smem>>
    %77 = vector.broadcast %76 : f32 to vector<2x256xf32>
    %78 = arith.mulf %16, %77 : vector<2x256xf32>
    %79 = arith.addf %75, %78 : vector<2x256xf32>
    %c0_2 = arith.constant 0 : index
    %c0_3 = arith.constant 0 : index
    %80 = vector.load %arg4[%c0_2, %c0_3] : memref<2x1024xf32, #tpu.memory_space<vmem>>, vector<2x256xf32>
    tpu.vector_store %arg4[%c0_2, %c0_3], %79 {strides = array<i32>} : memref<2x1024xf32, #tpu.memory_space<vmem>>, vector<2x256xf32>,
    %cst = arith.constant 0.000000e+00 : f32
    %81 = vector.broadcast %cst : f32 to vector<2x256xf32>
    %82 = arith.maximumf %79, %81 : vector<2x256xf32>
    %c0_4 = arith.constant 0 : index
    %c0_5 = arith.constant 0 : index
    %83 = vector.load %arg5[%c0_4, %c0_5] : memref<2x1024xf32, #tpu.memory_space<vmem>>, vector<2x256xf32>
    tpu.vector_store %arg5[%c0_4, %c0_5], %82 {strides = array<i32>} : memref<2x1024xf32, #tpu.memory_space<vmem>>, vector<2x256xf32>,
    %84 = vector.extract_strided_slice %82 {offsets = [0, 0], sizes = [2, 176], strides = [1, 1]} : vector<2x256xf32> to vector<2x176xf32>
    %85 = vector.extract_strided_slice %82 {offsets = [0, 1], sizes = [2, 176], strides = [1, 1]} : vector<2x256xf32> to vector<2x176xf32>
    %86 = arith.maximumf %84, %85 : vector<2x176xf32>
    %87 = vector.extract_strided_slice %82 {offsets = [0, 16], sizes = [2, 176], strides = [1, 1]} : vector<2x256xf32> to vector<2x176xf32>
    %88 = vector.extract_strided_slice %82 {offsets = [0, 17], sizes = [2, 176], strides = [1, 1]} : vector<2x256xf32> to vector<2x176xf32>
    %89 = arith.maximumf %87, %88 : vector<2x176xf32>
    %90 = arith.maximumf %86, %89 : vector<2x176xf32>
    %c0_6 = arith.constant 0 : index
    %c0_7 = arith.constant 0 : index
    %c0_8 = arith.constant 0 : index
    %91 = vector.load %arg7[%c0_6, %c0_7, %c0_8] : memref<4x2x176xf32, #tpu.memory_space<vmem>>, vector<1x2x176xf32>
    %92 = vector.shape_cast %91 : vector<1x2x176xf32> to vector<2x176xf32>
    %93 = vector.shape_cast %90 : vector<2x176xf32> to vector<1x2x176xf32>
    tpu.vector_store %arg7[%c0_6, %c0_7, %c0_8], %93 {strides = array<i32>} : memref<4x2x176xf32, #tpu.memory_space<vmem>>, vector<1x2x176xf32>,
    %c16 = arith.constant 16 : index
    %94 = memref.load %arg2[%c16] : memref<64xf32, #tpu.memory_space<smem>>
    %95 = vector.broadcast %94 : f32 to vector<2x256xf32>
    %96 = arith.mulf %1, %95 : vector<2x256xf32>
    %c17 = arith.constant 17 : index
    %97 = memref.load %arg2[%c17] : memref<64xf32, #tpu.memory_space<smem>>
    %98 = vector.broadcast %97 : f32 to vector<2x256xf32>
    %99 = arith.mulf %2, %98 : vector<2x256xf32>
    %100 = arith.addf %96, %99 : vector<2x256xf32>
    %c18 = arith.constant 18 : index
    %101 = memref.load %arg2[%c18] : memref<64xf32, #tpu.memory_space<smem>>
    %102 = vector.broadcast %101 : f32 to vector<2x256xf32>
    %103 = arith.mulf %3, %102 : vector<2x256xf32>
    %104 = arith.addf %100, %103 : vector<2x256xf32>
    %c19 = arith.constant 19 : index
    %105 = memref.load %arg2[%c19] : memref<64xf32, #tpu.memory_space<smem>>
    %106 = vector.broadcast %105 : f32 to vector<2x256xf32>
    %107 = arith.mulf %4, %106 : vector<2x256xf32>
    %108 = arith.addf %104, %107 : vector<2x256xf32>
    %c20 = arith.constant 20 : index
    %109 = memref.load %arg2[%c20] : memref<64xf32, #tpu.memory_space<smem>>
    %110 = vector.broadcast %109 : f32 to vector<2x256xf32>
    %111 = arith.mulf %5, %110 : vector<2x256xf32>
    %112 = arith.addf %108, %111 : vector<2x256xf32>
    %c21 = arith.constant 21 : index
    %113 = memref.load %arg2[%c21] : memref<64xf32, #tpu.memory_space<smem>>
    %114 = vector.broadcast %113 : f32 to vector<2x256xf32>
    %115 = arith.mulf %6, %114 : vector<2x256xf32>
    %116 = arith.addf %112, %115 : vector<2x256xf32>
    %c22 = arith.constant 22 : index
    %117 = memref.load %arg2[%c22] : memref<64xf32, #tpu.memory_space<smem>>
    %118 = vector.broadcast %117 : f32 to vector<2x256xf32>
    %119 = arith.mulf %7, %118 : vector<2x256xf32>
    %120 = arith.addf %116, %119 : vector<2x256xf32>
    %c23 = arith.constant 23 : index
    %121 = memref.load %arg2[%c23] : memref<64xf32, #tpu.memory_space<smem>>
    %122 = vector.broadcast %121 : f32 to vector<2x256xf32>
    %123 = arith.mulf %8, %122 : vector<2x256xf32>
    %124 = arith.addf %120, %123 : vector<2x256xf32>
    %c24 = arith.constant 24 : index
    %125 = memref.load %arg2[%c24] : memref<64xf32, #tpu.memory_space<smem>>
    %126 = vector.broadcast %125 : f32 to vector<2x256xf32>
    %127 = arith.mulf %9, %126 : vector<2x256xf32>
    %128 = arith.addf %124, %127 : vector<2x256xf32>
    %c25 = arith.constant 25 : index
    %129 = memref.load %arg2[%c25] : memref<64xf32, #tpu.memory_space<smem>>
    %130 = vector.broadcast %129 : f32 to vector<2x256xf32>
    %131 = arith.mulf %10, %130 : vector<2x256xf32>
    %132 = arith.addf %128, %131 : vector<2x256xf32>
    %c26 = arith.constant 26 : index
    %133 = memref.load %arg2[%c26] : memref<64xf32, #tpu.memory_space<smem>>
    %134 = vector.broadcast %133 : f32 to vector<2x256xf32>
    %135 = arith.mulf %11, %134 : vector<2x256xf32>
    %136 = arith.addf %132, %135 : vector<2x256xf32>
    %c27 = arith.constant 27 : index
    %137 = memref.load %arg2[%c27] : memref<64xf32, #tpu.memory_space<smem>>
    %138 = vector.broadcast %137 : f32 to vector<2x256xf32>
    %139 = arith.mulf %12, %138 : vector<2x256xf32>
    %140 = arith.addf %136, %139 : vector<2x256xf32>
    %c28 = arith.constant 28 : index
    %141 = memref.load %arg2[%c28] : memref<64xf32, #tpu.memory_space<smem>>
    %142 = vector.broadcast %141 : f32 to vector<2x256xf32>
    %143 = arith.mulf %13, %142 : vector<2x256xf32>
    %144 = arith.addf %140, %143 : vector<2x256xf32>
    %c29 = arith.constant 29 : index
    %145 = memref.load %arg2[%c29] : memref<64xf32, #tpu.memory_space<smem>>
    %146 = vector.broadcast %145 : f32 to vector<2x256xf32>
    %147 = arith.mulf %14, %146 : vector<2x256xf32>
    %148 = arith.addf %144, %147 : vector<2x256xf32>
    %c30 = arith.constant 30 : index
    %149 = memref.load %arg2[%c30] : memref<64xf32, #tpu.memory_space<smem>>
    %150 = vector.broadcast %149 : f32 to vector<2x256xf32>
    %151 = arith.mulf %15, %150 : vector<2x256xf32>
    %152 = arith.addf %148, %151 : vector<2x256xf32>
    %c31 = arith.constant 31 : index
    %153 = memref.load %arg2[%c31] : memref<64xf32, #tpu.memory_space<smem>>
    %154 = vector.broadcast %153 : f32 to vector<2x256xf32>
    %155 = arith.mulf %16, %154 : vector<2x256xf32>
    %156 = arith.addf %152, %155 : vector<2x256xf32>
    %c0_9 = arith.constant 0 : index
    %c256 = arith.constant 256 : index
    %157 = vector.load %arg4[%c0_9, %c256] : memref<2x1024xf32, #tpu.memory_space<vmem>>, vector<2x256xf32>
    tpu.vector_store %arg4[%c0_9, %c256], %156 {strides = array<i32>} : memref<2x1024xf32, #tpu.memory_space<vmem>>, vector<2x256xf32>,
    %cst_10 = arith.constant 0.000000e+00 : f32
    %158 = vector.broadcast %cst_10 : f32 to vector<2x256xf32>
    %159 = arith.maximumf %156, %158 : vector<2x256xf32>
    %c0_11 = arith.constant 0 : index
    %c256_12 = arith.constant 256 : index
    %160 = vector.load %arg5[%c0_11, %c256_12] : memref<2x1024xf32, #tpu.memory_space<vmem>>, vector<2x256xf32>
    tpu.vector_store %arg5[%c0_11, %c256_12], %159 {strides = array<i32>} : memref<2x1024xf32, #tpu.memory_space<vmem>>, vector<2x256xf32>,
    %161 = vector.extract_strided_slice %159 {offsets = [0, 0], sizes = [2, 176], strides = [1, 1]} : vector<2x256xf32> to vector<2x176xf32>
    %162 = vector.extract_strided_slice %159 {offsets = [0, 1], sizes = [2, 176], strides = [1, 1]} : vector<2x256xf32> to vector<2x176xf32>
    %163 = arith.maximumf %161, %162 : vector<2x176xf32>
    %164 = vector.extract_strided_slice %159 {offsets = [0, 16], sizes = [2, 176], strides = [1, 1]} : vector<2x256xf32> to vector<2x176xf32>
    %165 = vector.extract_strided_slice %159 {offsets = [0, 17], sizes = [2, 176], strides = [1, 1]} : vector<2x256xf32> to vector<2x176xf32>
    %166 = arith.maximumf %164, %165 : vector<2x176xf32>
    %167 = arith.maximumf %163, %166 : vector<2x176xf32>
    %c1_13 = arith.constant 1 : index
    %c0_14 = arith.constant 0 : index
    %c0_15 = arith.constant 0 : index
    %168 = vector.load %arg7[%c1_13, %c0_14, %c0_15] : memref<4x2x176xf32, #tpu.memory_space<vmem>>, vector<1x2x176xf32>
    %169 = vector.shape_cast %168 : vector<1x2x176xf32> to vector<2x176xf32>
    %170 = vector.shape_cast %167 : vector<2x176xf32> to vector<1x2x176xf32>
    tpu.vector_store %arg7[%c1_13, %c0_14, %c0_15], %170 {strides = array<i32>} : memref<4x2x176xf32, #tpu.memory_space<vmem>>, vector<1x2x176xf32>,
    %c32 = arith.constant 32 : index
    %171 = memref.load %arg2[%c32] : memref<64xf32, #tpu.memory_space<smem>>
    %172 = vector.broadcast %171 : f32 to vector<2x256xf32>
    %173 = arith.mulf %1, %172 : vector<2x256xf32>
    %c33 = arith.constant 33 : index
    %174 = memref.load %arg2[%c33] : memref<64xf32, #tpu.memory_space<smem>>
    %175 = vector.broadcast %174 : f32 to vector<2x256xf32>
    %176 = arith.mulf %2, %175 : vector<2x256xf32>
    %177 = arith.addf %173, %176 : vector<2x256xf32>
    %c34 = arith.constant 34 : index
    %178 = memref.load %arg2[%c34] : memref<64xf32, #tpu.memory_space<smem>>
    %179 = vector.broadcast %178 : f32 to vector<2x256xf32>
    %180 = arith.mulf %3, %179 : vector<2x256xf32>
    %181 = arith.addf %177, %180 : vector<2x256xf32>
    %c35 = arith.constant 35 : index
    %182 = memref.load %arg2[%c35] : memref<64xf32, #tpu.memory_space<smem>>
    %183 = vector.broadcast %182 : f32 to vector<2x256xf32>
    %184 = arith.mulf %4, %183 : vector<2x256xf32>
    %185 = arith.addf %181, %184 : vector<2x256xf32>
    %c36 = arith.constant 36 : index
    %186 = memref.load %arg2[%c36] : memref<64xf32, #tpu.memory_space<smem>>
    %187 = vector.broadcast %186 : f32 to vector<2x256xf32>
    %188 = arith.mulf %5, %187 : vector<2x256xf32>
    %189 = arith.addf %185, %188 : vector<2x256xf32>
    %c37 = arith.constant 37 : index
    %190 = memref.load %arg2[%c37] : memref<64xf32, #tpu.memory_space<smem>>
    %191 = vector.broadcast %190 : f32 to vector<2x256xf32>
    %192 = arith.mulf %6, %191 : vector<2x256xf32>
    %193 = arith.addf %189, %192 : vector<2x256xf32>
    %c38 = arith.constant 38 : index
    %194 = memref.load %arg2[%c38] : memref<64xf32, #tpu.memory_space<smem>>
    %195 = vector.broadcast %194 : f32 to vector<2x256xf32>
    %196 = arith.mulf %7, %195 : vector<2x256xf32>
    %197 = arith.addf %193, %196 : vector<2x256xf32>
    %c39 = arith.constant 39 : index
    %198 = memref.load %arg2[%c39] : memref<64xf32, #tpu.memory_space<smem>>
    %199 = vector.broadcast %198 : f32 to vector<2x256xf32>
    %200 = arith.mulf %8, %199 : vector<2x256xf32>
    %201 = arith.addf %197, %200 : vector<2x256xf32>
    %c40 = arith.constant 40 : index
    %202 = memref.load %arg2[%c40] : memref<64xf32, #tpu.memory_space<smem>>
    %203 = vector.broadcast %202 : f32 to vector<2x256xf32>
    %204 = arith.mulf %9, %203 : vector<2x256xf32>
    %205 = arith.addf %201, %204 : vector<2x256xf32>
    %c41 = arith.constant 41 : index
    %206 = memref.load %arg2[%c41] : memref<64xf32, #tpu.memory_space<smem>>
    %207 = vector.broadcast %206 : f32 to vector<2x256xf32>
    %208 = arith.mulf %10, %207 : vector<2x256xf32>
    %209 = arith.addf %205, %208 : vector<2x256xf32>
    %c42 = arith.constant 42 : index
    %210 = memref.load %arg2[%c42] : memref<64xf32, #tpu.memory_space<smem>>
    %211 = vector.broadcast %210 : f32 to vector<2x256xf32>
    %212 = arith.mulf %11, %211 : vector<2x256xf32>
    %213 = arith.addf %209, %212 : vector<2x256xf32>
    %c43 = arith.constant 43 : index
    %214 = memref.load %arg2[%c43] : memref<64xf32, #tpu.memory_space<smem>>
    %215 = vector.broadcast %214 : f32 to vector<2x256xf32>
    %216 = arith.mulf %12, %215 : vector<2x256xf32>
    %217 = arith.addf %213, %216 : vector<2x256xf32>
    %c44 = arith.constant 44 : index
    %218 = memref.load %arg2[%c44] : memref<64xf32, #tpu.memory_space<smem>>
    %219 = vector.broadcast %218 : f32 to vector<2x256xf32>
    %220 = arith.mulf %13, %219 : vector<2x256xf32>
    %221 = arith.addf %217, %220 : vector<2x256xf32>
    %c45 = arith.constant 45 : index
    %222 = memref.load %arg2[%c45] : memref<64xf32, #tpu.memory_space<smem>>
    %223 = vector.broadcast %222 : f32 to vector<2x256xf32>
    %224 = arith.mulf %14, %223 : vector<2x256xf32>
    %225 = arith.addf %221, %224 : vector<2x256xf32>
    %c46 = arith.constant 46 : index
    %226 = memref.load %arg2[%c46] : memref<64xf32, #tpu.memory_space<smem>>
    %227 = vector.broadcast %226 : f32 to vector<2x256xf32>
    %228 = arith.mulf %15, %227 : vector<2x256xf32>
    %229 = arith.addf %225, %228 : vector<2x256xf32>
    %c47 = arith.constant 47 : index
    %230 = memref.load %arg2[%c47] : memref<64xf32, #tpu.memory_space<smem>>
    %231 = vector.broadcast %230 : f32 to vector<2x256xf32>
    %232 = arith.mulf %16, %231 : vector<2x256xf32>
    %233 = arith.addf %229, %232 : vector<2x256xf32>
    %c0_16 = arith.constant 0 : index
    %c512 = arith.constant 512 : index
    %234 = vector.load %arg4[%c0_16, %c512] : memref<2x1024xf32, #tpu.memory_space<vmem>>, vector<2x256xf32>
    tpu.vector_store %arg4[%c0_16, %c512], %233 {strides = array<i32>} : memref<2x1024xf32, #tpu.memory_space<vmem>>, vector<2x256xf32>,
    %cst_17 = arith.constant 0.000000e+00 : f32
    %235 = vector.broadcast %cst_17 : f32 to vector<2x256xf32>
    %236 = arith.maximumf %233, %235 : vector<2x256xf32>
    %c0_18 = arith.constant 0 : index
    %c512_19 = arith.constant 512 : index
    %237 = vector.load %arg5[%c0_18, %c512_19] : memref<2x1024xf32, #tpu.memory_space<vmem>>, vector<2x256xf32>
    tpu.vector_store %arg5[%c0_18, %c512_19], %236 {strides = array<i32>} : memref<2x1024xf32, #tpu.memory_space<vmem>>, vector<2x256xf32>,
    %238 = vector.extract_strided_slice %236 {offsets = [0, 0], sizes = [2, 176], strides = [1, 1]} : vector<2x256xf32> to vector<2x176xf32>
    %239 = vector.extract_strided_slice %236 {offsets = [0, 1], sizes = [2, 176], strides = [1, 1]} : vector<2x256xf32> to vector<2x176xf32>
    %240 = arith.maximumf %238, %239 : vector<2x176xf32>
    %241 = vector.extract_strided_slice %236 {offsets = [0, 16], sizes = [2, 176], strides = [1, 1]} : vector<2x256xf32> to vector<2x176xf32>
    %242 = vector.extract_strided_slice %236 {offsets = [0, 17], sizes = [2, 176], strides = [1, 1]} : vector<2x256xf32> to vector<2x176xf32>
    %243 = arith.maximumf %241, %242 : vector<2x176xf32>
    %244 = arith.maximumf %240, %243 : vector<2x176xf32>
    %c2_20 = arith.constant 2 : index
    %c0_21 = arith.constant 0 : index
    %c0_22 = arith.constant 0 : index
    %245 = vector.load %arg7[%c2_20, %c0_21, %c0_22] : memref<4x2x176xf32, #tpu.memory_space<vmem>>, vector<1x2x176xf32>
    %246 = vector.shape_cast %245 : vector<1x2x176xf32> to vector<2x176xf32>
    %247 = vector.shape_cast %244 : vector<2x176xf32> to vector<1x2x176xf32>
    tpu.vector_store %arg7[%c2_20, %c0_21, %c0_22], %247 {strides = array<i32>} : memref<4x2x176xf32, #tpu.memory_space<vmem>>, vector<1x2x176xf32>,
    %c48 = arith.constant 48 : index
    %248 = memref.load %arg2[%c48] : memref<64xf32, #tpu.memory_space<smem>>
    %249 = vector.broadcast %248 : f32 to vector<2x256xf32>
    %250 = arith.mulf %1, %249 : vector<2x256xf32>
    %c49 = arith.constant 49 : index
    %251 = memref.load %arg2[%c49] : memref<64xf32, #tpu.memory_space<smem>>
    %252 = vector.broadcast %251 : f32 to vector<2x256xf32>
    %253 = arith.mulf %2, %252 : vector<2x256xf32>
    %254 = arith.addf %250, %253 : vector<2x256xf32>
    %c50 = arith.constant 50 : index
    %255 = memref.load %arg2[%c50] : memref<64xf32, #tpu.memory_space<smem>>
    %256 = vector.broadcast %255 : f32 to vector<2x256xf32>
    %257 = arith.mulf %3, %256 : vector<2x256xf32>
    %258 = arith.addf %254, %257 : vector<2x256xf32>
    %c51 = arith.constant 51 : index
    %259 = memref.load %arg2[%c51] : memref<64xf32, #tpu.memory_space<smem>>
    %260 = vector.broadcast %259 : f32 to vector<2x256xf32>
    %261 = arith.mulf %4, %260 : vector<2x256xf32>
    %262 = arith.addf %258, %261 : vector<2x256xf32>
    %c52 = arith.constant 52 : index
    %263 = memref.load %arg2[%c52] : memref<64xf32, #tpu.memory_space<smem>>
    %264 = vector.broadcast %263 : f32 to vector<2x256xf32>
    %265 = arith.mulf %5, %264 : vector<2x256xf32>
    %266 = arith.addf %262, %265 : vector<2x256xf32>
    %c53 = arith.constant 53 : index
    %267 = memref.load %arg2[%c53] : memref<64xf32, #tpu.memory_space<smem>>
    %268 = vector.broadcast %267 : f32 to vector<2x256xf32>
    %269 = arith.mulf %6, %268 : vector<2x256xf32>
    %270 = arith.addf %266, %269 : vector<2x256xf32>
    %c54 = arith.constant 54 : index
    %271 = memref.load %arg2[%c54] : memref<64xf32, #tpu.memory_space<smem>>
    %272 = vector.broadcast %271 : f32 to vector<2x256xf32>
    %273 = arith.mulf %7, %272 : vector<2x256xf32>
    %274 = arith.addf %270, %273 : vector<2x256xf32>
    %c55 = arith.constant 55 : index
    %275 = memref.load %arg2[%c55] : memref<64xf32, #tpu.memory_space<smem>>
    %276 = vector.broadcast %275 : f32 to vector<2x256xf32>
    %277 = arith.mulf %8, %276 : vector<2x256xf32>
    %278 = arith.addf %274, %277 : vector<2x256xf32>
    %c56 = arith.constant 56 : index
    %279 = memref.load %arg2[%c56] : memref<64xf32, #tpu.memory_space<smem>>
    %280 = vector.broadcast %279 : f32 to vector<2x256xf32>
    %281 = arith.mulf %9, %280 : vector<2x256xf32>
    %282 = arith.addf %278, %281 : vector<2x256xf32>
    %c57 = arith.constant 57 : index
    %283 = memref.load %arg2[%c57] : memref<64xf32, #tpu.memory_space<smem>>
    %284 = vector.broadcast %283 : f32 to vector<2x256xf32>
    %285 = arith.mulf %10, %284 : vector<2x256xf32>
    %286 = arith.addf %282, %285 : vector<2x256xf32>
    %c58 = arith.constant 58 : index
    %287 = memref.load %arg2[%c58] : memref<64xf32, #tpu.memory_space<smem>>
    %288 = vector.broadcast %287 : f32 to vector<2x256xf32>
    %289 = arith.mulf %11, %288 : vector<2x256xf32>
    %290 = arith.addf %286, %289 : vector<2x256xf32>
    %c59 = arith.constant 59 : index
    %291 = memref.load %arg2[%c59] : memref<64xf32, #tpu.memory_space<smem>>
    %292 = vector.broadcast %291 : f32 to vector<2x256xf32>
    %293 = arith.mulf %12, %292 : vector<2x256xf32>
    %294 = arith.addf %290, %293 : vector<2x256xf32>
    %c60 = arith.constant 60 : index
    %295 = memref.load %arg2[%c60] : memref<64xf32, #tpu.memory_space<smem>>
    %296 = vector.broadcast %295 : f32 to vector<2x256xf32>
    %297 = arith.mulf %13, %296 : vector<2x256xf32>
    %298 = arith.addf %294, %297 : vector<2x256xf32>
    %c61 = arith.constant 61 : index
    %299 = memref.load %arg2[%c61] : memref<64xf32, #tpu.memory_space<smem>>
    %300 = vector.broadcast %299 : f32 to vector<2x256xf32>
    %301 = arith.mulf %14, %300 : vector<2x256xf32>
    %302 = arith.addf %298, %301 : vector<2x256xf32>
    %c62 = arith.constant 62 : index
    %303 = memref.load %arg2[%c62] : memref<64xf32, #tpu.memory_space<smem>>
    %304 = vector.broadcast %303 : f32 to vector<2x256xf32>
    %305 = arith.mulf %15, %304 : vector<2x256xf32>
    %306 = arith.addf %302, %305 : vector<2x256xf32>
    %c63 = arith.constant 63 : index
    %307 = memref.load %arg2[%c63] : memref<64xf32, #tpu.memory_space<smem>>
    %308 = vector.broadcast %307 : f32 to vector<2x256xf32>
    %309 = arith.mulf %16, %308 : vector<2x256xf32>
    %310 = arith.addf %306, %309 : vector<2x256xf32>
    %c0_23 = arith.constant 0 : index
    %c768 = arith.constant 768 : index
    %311 = vector.load %arg4[%c0_23, %c768] : memref<2x1024xf32, #tpu.memory_space<vmem>>, vector<2x256xf32>
    tpu.vector_store %arg4[%c0_23, %c768], %310 {strides = array<i32>} : memref<2x1024xf32, #tpu.memory_space<vmem>>, vector<2x256xf32>,
    %cst_24 = arith.constant 0.000000e+00 : f32
    %312 = vector.broadcast %cst_24 : f32 to vector<2x256xf32>
    %313 = arith.maximumf %310, %312 : vector<2x256xf32>
    %c0_25 = arith.constant 0 : index
    %c768_26 = arith.constant 768 : index
    %314 = vector.load %arg5[%c0_25, %c768_26] : memref<2x1024xf32, #tpu.memory_space<vmem>>, vector<2x256xf32>
    tpu.vector_store %arg5[%c0_25, %c768_26], %313 {strides = array<i32>} : memref<2x1024xf32, #tpu.memory_space<vmem>>, vector<2x256xf32>,
    %315 = vector.extract_strided_slice %313 {offsets = [0, 0], sizes = [2, 176], strides = [1, 1]} : vector<2x256xf32> to vector<2x176xf32>
    %316 = vector.extract_strided_slice %313 {offsets = [0, 1], sizes = [2, 176], strides = [1, 1]} : vector<2x256xf32> to vector<2x176xf32>
    %317 = arith.maximumf %315, %316 : vector<2x176xf32>
    %318 = vector.extract_strided_slice %313 {offsets = [0, 16], sizes = [2, 176], strides = [1, 1]} : vector<2x256xf32> to vector<2x176xf32>
    %319 = vector.extract_strided_slice %313 {offsets = [0, 17], sizes = [2, 176], strides = [1, 1]} : vector<2x256xf32> to vector<2x176xf32>
    %320 = arith.maximumf %318, %319 : vector<2x176xf32>
    %321 = arith.maximumf %317, %320 : vector<2x176xf32>
    %c3_27 = arith.constant 3 : index
    %c0_28 = arith.constant 0 : index
    %c0_29 = arith.constant 0 : index
    %322 = vector.load %arg7[%c3_27, %c0_28, %c0_29] : memref<4x2x176xf32, #tpu.memory_space<vmem>>, vector<1x2x176xf32>
    %323 = vector.shape_cast %322 : vector<1x2x176xf32> to vector<2x176xf32>
    %324 = vector.shape_cast %321 : vector<2x176xf32> to vector<1x2x176xf32>
    tpu.vector_store %arg7[%c3_27, %c0_28, %c0_29], %324 {strides = array<i32>} : memref<4x2x176xf32, #tpu.memory_space<vmem>>, vector<1x2x176xf32>,
    %c0_30 = arith.constant 0 : index
    %c0_31 = arith.constant 0 : index
    %c0_32 = arith.constant 0 : index
    %325 = vector.load %arg7[%c0_30, %c0_31, %c0_32] : memref<4x2x176xf32, #tpu.memory_space<vmem>>, vector<4x2x176xf32>
    %326 = vector.shape_cast %325 : vector<4x2x176xf32> to vector<8x176xf32>
    %c0_33 = arith.constant 0 : index
    %c0_34 = arith.constant 0 : index
    %327 = vector.load %arg3[%c0_33, %c0_34] : memref<176x128xf32, #tpu.memory_space<vmem>>, vector<176x128xf32>
    %cst_35 = arith.constant dense<0.000000e+00> : vector<8x128xf32>
    %328 = tpu.matmul %326, %327, %cst_35 {dimension_numbers = #tpu.dot_dimension_numbers<[1], [0], [0], [1], [0, 0, 1, 1], [], []>} : vector<8x176xf32>, vector<176x128xf32>, vector<8x128xf32> -> vector<8x128xf32>
    %329 = vector.shape_cast %328 : vector<8x128xf32> to vector<4x2x128xf32>
    %330 = vector.extract_strided_slice %329 {offsets = [0, 0, 0], sizes = [1, 2, 128], strides = [1, 1, 1]} : vector<4x2x128xf32> to vector<1x2x128xf32>
    %331 = vector.shape_cast %330 : vector<1x2x128xf32> to vector<2x128xf32>
    %c0_36 = arith.constant 0 : index
    %c0_37 = arith.constant 0 : index
    %332 = vector.load %arg6[%c0_36, %c0_37] : memref<2x512xf32, #tpu.memory_space<vmem>>, vector<2x128xf32>
    tpu.vector_store %arg6[%c0_36, %c0_37], %331 {strides = array<i32>} : memref<2x512xf32, #tpu.memory_space<vmem>>, vector<2x128xf32>,
    %333 = vector.extract_strided_slice %329 {offsets = [1, 0, 0], sizes = [1, 2, 128], strides = [1, 1, 1]} : vector<4x2x128xf32> to vector<1x2x128xf32>
    %334 = vector.shape_cast %333 : vector<1x2x128xf32> to vector<2x128xf32>
    %c0_38 = arith.constant 0 : index
    %c128 = arith.constant 128 : index
    %335 = vector.load %arg6[%c0_38, %c128] : memref<2x512xf32, #tpu.memory_space<vmem>>, vector<2x128xf32>
    tpu.vector_store %arg6[%c0_38, %c128], %334 {strides = array<i32>} : memref<2x512xf32, #tpu.memory_space<vmem>>, vector<2x128xf32>,
    %336 = vector.extract_strided_slice %329 {offsets = [2, 0, 0], sizes = [1, 2, 128], strides = [1, 1, 1]} : vector<4x2x128xf32> to vector<1x2x128xf32>
    %337 = vector.shape_cast %336 : vector<1x2x128xf32> to vector<2x128xf32>
    %c0_39 = arith.constant 0 : index
    %c256_40 = arith.constant 256 : index
    %338 = vector.load %arg6[%c0_39, %c256_40] : memref<2x512xf32, #tpu.memory_space<vmem>>, vector<2x128xf32>
    tpu.vector_store %arg6[%c0_39, %c256_40], %337 {strides = array<i32>} : memref<2x512xf32, #tpu.memory_space<vmem>>, vector<2x128xf32>,
    %339 = vector.extract_strided_slice %329 {offsets = [3, 0, 0], sizes = [1, 2, 128], strides = [1, 1, 1]} : vector<4x2x128xf32> to vector<1x2x128xf32>
    %340 = vector.shape_cast %339 : vector<1x2x128xf32> to vector<2x128xf32>
    %c0_41 = arith.constant 0 : index
    %c384 = arith.constant 384 : index
    %341 = vector.load %arg6[%c0_41, %c384] : memref<2x512xf32, #tpu.memory_space<vmem>>, vector<2x128xf32>
    tpu.vector_store %arg6[%c0_41, %c384], %340 {strides = array<i32>} : memref<2x512xf32, #tpu.memory_space<vmem>>, vector<2x128xf32>,
    return
  }
  func.func @transform_0(%arg0: i32) -> (i32, i32) {
    %c0_i32 = arith.constant 0 : i32
    %c0_i32_0 = arith.constant 0 : i32
    return %arg0, %c0_i32 : i32, i32
  }
  func.func @transform_1(%arg0: i32) -> i32 {
    %c0_i32 = arith.constant 0 : i32
    %c0_i32_0 = arith.constant 0 : i32
    return %c0_i32 : i32
  }
  func.func @transform_2(%arg0: i32) -> (i32, i32) {
    %c0_i32 = arith.constant 0 : i32
    %c0_i32_0 = arith.constant 0 : i32
    %c0_i32_1 = arith.constant 0 : i32
    return %c0_i32, %c0_i32_0 : i32, i32
  }
  func.func @transform_3(%arg0: i32) -> (i32, i32) {
    %c0_i32 = arith.constant 0 : i32
    %c0_i32_0 = arith.constant 0 : i32
    return %arg0, %c0_i32 : i32, i32
  }
  func.func @transform_4(%arg0: i32) -> (i32, i32) {
    %c0_i32 = arith.constant 0 : i32
    %c0_i32_0 = arith.constant 0 : i32
    return %arg0, %c0_i32 : i32, i32
  }
  func.func @transform_5(%arg0: i32) -> (i32, i32) {
    %c0_i32 = arith.constant 0 : i32
    %c0_i32_0 = arith.constant 0 : i32
    return %arg0, %c0_i32 : i32, i32
  }
}

</mosaic_0001>

<bundles_post_ra>
// kernel: network_forward.1
= control target key start
LH: loop header
LB: loop body
LE: loop exit
PB: predicated region body
PF: predicated region fallthrough
CT: control target
= control target key end

     0   :  { %11 = vsyncpa [#allocation4], 0  ;;  %s937_s21 = smov [#allocation3]   ;;  %s1384_s0 = inlined_call_operand.vmem [shape: f32[2,384], index: 0, kind: input, shape index: {}]   ;;  %s1385_s1 = inlined_call_operand.vmem [shape: f32[64], index: 1, kind: input, shape index: {}]   ;;  %s1386_s2 = inlined_call_operand.vmem [shape: f32[176,128], index: 2, kind: input, shape index: {}]   ;;  %s1387_s3 = inlined_call_operand.vmem [shape: f32[2,1024], index: 3, kind: output, shape index: {0}]   ;;  %s1388_s4 = inlined_call_operand.vmem [shape: f32[2,1024], index: 4, kind: output, shape index: {1}]   ;;  %s1389_s5 = inlined_call_operand.vmem [shape: f32[2,512], index: 5, kind: output, shape index: {2}]  }
   0x1   :  { %s19_s20 = sshll.u32 %s1385_s1, 4  ;;  %s20_s20 = int_to_ptr.vmem [resolvable:$true] %s19_s20 }
   0x2   :  { %22 = dma.vmem_to_smem %s20_s20, 16, %s937_s21, [#allocation4]  }
   0x3   :  { %935 = dma.done.wait [#allocation4], 16  }
   0x4   :  { %936 = vsyncadd [#allocation4], 4294967280 }
   0x5   :  { %29 = sfence }
   0x6   :  { %s875_s22 = sld [smem:[#allocation3 + $0x21]]  ;;  %v989_v0 = vld [vmem:[%s1384_s0] sm:$0x3f]  ;;  %s938_s29 = smov 127   ;;  %vm41_vm0 = vcmask 1039360   ;;  %vm52_vm1 = vcmask 1031168  }
   0x7   :  { %s843_s23 = sld [smem:[#allocation3 + $0x1]]  ;;  %s939_s6 = smov 126   ;;  %vm63_vm2 = vcmask 1022976   ;;  %vm74_vm3 = vcmask 916480   ;;  %vm85_vm4 = vcmask 908288   ;;  %vm96_vm5 = vcmask 900096  }
   0x8   :  { %s891_s24 = sld [smem:[#allocation3 + $0x31]]  ;;  %s940_s13 = smov 125   ;;  %vm107_vm6 = vcmask 891904   ;;  %vm118_vm7 = vcmask 785408   ;;  %vm129_vm8 = vcmask 777216   ;;  %vm140_vm9 = vcmask 769024  }
   0x9   :  { %s859_s25 = sld [smem:[#allocation3 + $0x11]]  ;;  %s941_s18 = smov 112   ;;  %vm151_vm10 = vcmask 760832   ;;  %vm162_vm11 = vcmask 654336   ;;  %vm173_vm12 = vcmask 646144   ;;  %vm184_vm13 = vcmask 637952  }
   0xa   :  { %s844_s28 = sld [smem:[#allocation3 + $0x2]]  ;;  %vm195_vm14 = vcmask 629760   ;;  %vm216_vm15 = vcmask 1041408  }
   0xb   :  { %s860_s1 = sld [smem:[#allocation3 + $0x12]] }
   0xc   :  { %v396_v1 = vstv %s875_s22  ;;  %s892_s30 = sld [smem:[#allocation3 + $0x32]]  ;;  %s942_s22 = smov 111  }
   0xd   :  { %v397_v2 = vmul.f32 %v396_v1, %v989_v0  ;;  %v35_v3 = vstv %s843_s23  ;;  %s876_s0 = sld [smem:[#allocation3 + $0x22]] }
   0xe   :  { %v36_v4 = vmul.f32 %v35_v3, %v989_v0  ;;  %v568_v5 = vstv %s891_s24  ;;  %s845_s7 = sld [smem:[#allocation3 + $0x3]] }
   0xf   :  { %399 = vrot.lane.b32.xlu1 %v397_v2, %s938_s29  ;;  %v224_v7 = vstv %s859_s25  ;;  %v569_v9 = vmul.f32 %v568_v5, %v989_v0  ;;  %s877_s8 = sld [smem:[#allocation3 + $0x23]] }
  0x10   :  { %38 = vrot.lane.b32.xlu0 %v36_v4, %s938_s29  ;;  %v46_v6 = vstv %s844_s28  ;;  %v225_v10 = vmul.f32 %v224_v7, %v989_v0  ;;  %s861_s9 = sld [smem:[#allocation3 + $0x13]]  ;;  %s943_s28 = smov 110  }
  0x11   :  { %v47_v8 = vmul.f32 %v46_v6, %v989_v0  ;;  %v234_v11 = vstv %s860_s1  ;;  %s893_s10 = sld [smem:[#allocation3 + $0x33]] }
  0x12   :  { %v235_v12 = vmul.f32 %v234_v11, %v989_v0  ;;  %v578_v13 = vstv %s892_s30  ;;  %s862_s11 = sld [smem:[#allocation3 + $0x14]] }
  0x13   :  { %49 = vrot.lane.b32.xlu2 %v47_v8, %s939_s6  ;;  %v406_v14 = vstv %s876_s0  ;;  %v579_v15 = vmul.f32 %v578_v13, %v989_v0  ;;  %s846_s12 = sld [smem:[#allocation3 + $0x4]] }
  0x14   :  { %v407_v16 = vmul.f32 %v406_v14, %v989_v0  ;;  %v57_v17 = vstv %s845_s7  ;;  %s878_s14 = sld [smem:[#allocation3 + $0x24]]  ;;  %s944_s7 = smov 109  }
  0x15   :  { %v58_v18 = vmul.f32 %v57_v17, %v989_v0  ;;  %v416_v19 = vstv %s877_s8  ;;  %s847_s15 = sld [smem:[#allocation3 + $0x5]] }
  0x16   :  { %v244_v20 = vstv %s861_s9  ;;  %v417_v21 = vmul.f32 %v416_v19, %v989_v0  ;;  %s894_s16 = sld [smem:[#allocation3 + $0x34]] }
  0x17   :  { %571 = vrot.lane.b32.xlu1 %v569_v9, %s938_s29  ;;  %v245_v22 = vmul.f32 %v244_v20, %v989_v0  ;;  %v588_v23 = vstv %s893_s10  ;;  %s863_s17 = sld [smem:[#allocation3 + $0x15]] }
  0x18   :  { %227 = vrot.lane.b32.xlu0 %v225_v10, %s938_s29  ;;  %v589_v24 = vmul.f32 %v588_v23, %v989_v0  ;;  %v254_v25 = vstv %s862_s11  ;;  %s895_s19 = sld [smem:[#allocation3 + $0x35]]  ;;  %s945_s11 = smov 96  }
  0x19   :  { %v68_v26 = vstv %s846_s12  ;;  %v255_v27 = vmul.f32 %v254_v25, %v989_v0  ;;  %s879_s20 = sld [smem:[#allocation3 + $0x25]] }
  0x1a   :  { %v69_v28 = vmul.f32 %v68_v26, %v989_v0  ;;  %v426_v29 = vstv %s878_s14  ;;  %s848_s21 = sld [smem:[#allocation3 + $0x6]] }
  0x1b   :  { %237 = vrot.lane.b32.xlu2 %v235_v12, %s939_s6  ;;  %v427_v30 = vmul.f32 %v426_v29, %v989_v0  ;;  %v79_v31 = vstv %s847_s15  ;;  %s880_s23 = sld [smem:[#allocation3 + $0x26]] }
  0x1c   :  { %v598_v32 = vstv %s894_s16  ;;  %v80_v33 = vmul.f32 %v79_v31, %v989_v0  ;;  %s864_s24 = sld [smem:[#allocation3 + $0x16]] }
  0x1d   :  { %v599_v34 = vmul.f32 %v598_v32, %v989_v0  ;;  %v264_v35 = vstv %s863_s17  ;;  %s896_s25 = sld [smem:[#allocation3 + $0x36]]  ;;  %s946_s17 = smov 95  }
  0x1e   :  { %v265_v36 = vmul.f32 %v264_v35, %v989_v0  ;;  %v608_v37 = vstv %s895_s19  ;;  %s865_s26 = sld [smem:[#allocation3 + $0x17]] }
  0x1f   :  { %581 = vrot.lane.b32.xlu1 %v579_v15, %s939_s6  ;;  %v436_v38 = vstv %s879_s20  ;;  %v609_v39 = vmul.f32 %v608_v37, %v989_v0  ;;  %s849_s27 = sld [smem:[#allocation3 + $0x7]] }
  0x20   :  { %409 = vrot.lane.b32.xlu0 %v407_v16, %s939_s6  ;;  %v437_v40 = vmul.f32 %v436_v38, %v989_v0  ;;  %v90_v41 = vstv %s848_s21  ;;  %s881_s1 = sld [smem:[#allocation3 + $0x27]] }
  0x21   :  { %v91_v42 = vmul.f32 %v90_v41, %v989_v0  ;;  %v446_v43 = vstv %s880_s23  ;;  %s850_s30 = sld [smem:[#allocation3 + $0x8]]  ;;  %s947_s23 = smov 94  }
  0x22   :  { %v274_v44 = vstv %s864_s24  ;;  %v447_v45 = vmul.f32 %v446_v43, %v989_v0  ;;  %s897_s0 = sld [smem:[#allocation3 + $0x37]] }
  0x23   :  { %60 = vrot.lane.b32.xlu2 %v58_v18, %s940_s13  ;;  %v275_v46 = vmul.f32 %v274_v44, %v989_v0  ;;  %v618_v47 = vstv %s896_s25  ;;  %s866_s6 = sld [smem:[#allocation3 + $0x18]] }
  0x24   :  { %v619_v48 = vmul.f32 %v618_v47, %v989_v0  ;;  %v284_v49 = vstv %s865_s26  ;;  %s898_s8 = sld [smem:[#allocation3 + $0x38]] }
  0x25   :  { %v101_v50 = vstv %s849_s27  ;;  %v285_v51 = vmul.f32 %v284_v49, %v989_v0  ;;  %s882_s9 = sld [smem:[#allocation3 + $0x28]]  ;;  %s948_s27 = smov 93  }
  0x26   :  { %v102_v52 = vmul.f32 %v101_v50, %v989_v0  ;;  %v456_v53 = vstv %s881_s1  ;;  %s851_s10 = sld [smem:[#allocation3 + $0x9]] }
  0x27   :  { %419 = vrot.lane.b32.xlu1 %v417_v21, %s940_s13  ;;  %v457_v54 = vmul.f32 %v456_v53, %v989_v0  ;;  %v112_v55 = vstv %s850_s30  ;;  %s883_s12 = sld [smem:[#allocation3 + $0x29]] }
  0x28   :  { %247 = vrot.lane.b32.xlu0 %v245_v22, %s940_s13  ;;  %v628_v56 = vstv %s897_s0  ;;  %v113_v57 = vmul.f32 %v112_v55, %v989_v0  ;;  %s899_s14 = sld [smem:[#allocation3 + $0x39]] }
  0x29   :  { %v629_v58 = vmul.f32 %v628_v56, %v989_v0  ;;  %v294_v59 = vstv %s866_s6  ;;  %s868_s15 = sld [smem:[#allocation3 + $0x1a]] }
  0x2a   :  { %v295_v60 = vmul.f32 %v294_v59, %v989_v0  ;;  %v638_v61 = vstv %s898_s8  ;;  %s852_s16 = sld [smem:[#allocation3 + $0xa]] }
  0x2b   :  { %591 = vrot.lane.b32.xlu2 %v589_v24, %s940_s13  ;;  %v466_v62 = vstv %s882_s9  ;;  %s867_s13 = sld [smem:[#allocation3 + $0x19]]  ;;  %v639_v63 = vmul.f32 %v638_v61, %v989_v0 }
  0x2c   :  { %v467_v1 = vmul.f32 %v466_v62, %v989_v0  ;;  %v123_v2 = vstv %s851_s10  ;;  %s884_s19 = sld [smem:[#allocation3 + $0x2a]]  ;;  %s949_s10 = smov 80  }
  0x2d   :  { %v124_v3 = vmul.f32 %v123_v2, %v989_v0  ;;  %v476_v4 = vstv %s883_s12  ;;  %s853_s20 = sld [smem:[#allocation3 + $0xb]] }
  0x2e   :  { %v477_v6 = vmul.f32 %v476_v4, %v989_v0  ;;  %v648_v8 = vstv %s899_s14  ;;  %s900_s21 = sld [smem:[#allocation3 + $0x3a]] }
  0x2f   :  { %257 = vrot.lane.b32.xlu1 %v255_v27, %s941_s18  ;;  %v649_v9 = vmul.f32 %v648_v8, %v989_v0  ;;  %v314_v10 = vstv %s868_s15  ;;  %s901_s24 = sld [smem:[#allocation3 + $0x3b]] }
  0x30   :  { %71 = vrot.lane.b32.xlu0 %v69_v28, %s941_s18  ;;  %v134_v11 = vstv %s852_s16  ;;  %v315_v12 = vmul.f32 %v314_v10, %v989_v0  ;;  %s885_s25 = sld [smem:[#allocation3 + $0x2b]]  ;;  %s950_s16 = smov 79  }
  0x31   :  { %v304_v5 = vstv %s867_s13  ;;  %v135_v13 = vmul.f32 %v134_v11, %v989_v0  ;;  %s854_s26 = sld [smem:[#allocation3 + $0xc]] }
  0x32   :  { %v305_v7 = vmul.f32 %v304_v5, %v989_v0  ;;  %v486_v14 = vstv %s884_s19  ;;  %s886_s1 = sld [smem:[#allocation3 + $0x2c]] }
  0x33   :  { %429 = vrot.lane.b32.xlu2 %v427_v30, %s941_s18  ;;  %v487_v16 = vmul.f32 %v486_v14, %v989_v0  ;;  %v145_v17 = vstv %s853_s20  ;;  %s870_s30 = sld [smem:[#allocation3 + $0x1c]] }
  0x34   :  { %v658_v18 = vstv %s900_s21  ;;  %v146_v19 = vmul.f32 %v145_v17, %v989_v0  ;;  %s1045_s0 = sld [smem:[#allocation3 + $0x3c]]  ;;  %s951_s21 = smov 78  }
  0x35   :  { %v659_v20 = vmul.f32 %v658_v18, %v989_v0  ;;  %v668_v24 = vstv %s901_s24  ;;  %s1047_s6 = sld [smem:[#allocation3 + $0x10]] }
  0x36   :  { %v496_v25 = vstv %s885_s25  ;;  %v669_v26 = vmul.f32 %v668_v24, %v989_v0  ;;  %s1054_s8 = sld [smem:[#allocation3 + $0xd]]  ;;  %s952_s25 = smov 77  }
  0x37   :  { %82 = vrot.lane.b32.xlu1 %v80_v33, %s942_s22  ;;  %v497_v27 = vmul.f32 %v496_v25, %v989_v0  ;;  %v156_v28 = vstv %s854_s26  ;;  %s1058_s9 = sld [smem:[#allocation3 + $0x30]] }
  0x38   :  { %601 = vrot.lane.b32.xlu0 %v599_v34, %s941_s18  ;;  %v157_v31 = vmul.f32 %v156_v28, %v989_v0  ;;  %v506_v32 = vstv %s886_s1  ;;  %s1064_s12 = sld [smem:[#allocation3 + $0x20]] }
  0x39   :  { %v334_v34 = vstv %s870_s30  ;;  %s1072_s13 = sld [smem:[#allocation3 + $0xe]] }
  0x3a   :  { %v335_v41 = vmul.f32 %v334_v34, %v989_v0  ;;  %s1075_s14 = sld [smem:[#allocation3 + $0x3d]] }
  0x3b   :  { %267 = vrot.lane.b32.xlu2 %v265_v36, %s942_s22  ;;  %s1085_s15 = sld [smem:[#allocation3 + $0x1e]] }
  0x3c   :  { %v167_v53 = vstv %s1054_s8  ;;  %s1104_s19 = sld [smem:[#allocation3 + $0x2e]] }
  0x3d   :  { %v168_v62 = vmul.f32 %v167_v53, %v989_v0  ;;  %s1111_s20 = sld [smem:[#allocation3 + $0xf]] }
  0x3e   :  { %s1129_s24 = sld [smem:[#allocation3 + $0x3f]] }
  0x3f   :  { %611 = vrot.lane.b32.xlu1 %v609_v39, %s942_s22  ;;  %v178_v11 = vstv %s1072_s13 }
  0x40   :  { %439 = vrot.lane.b32.xlu0 %v437_v40, %s942_s22  ;;  %s869_s22 = sld [smem:[#allocation3 + $0x1b]]  ;;  %v507_v40 = vmul.f32 %v506_v32, %v989_v0 }
  0x41   :  { %v354_v25 = vstv %s1085_s15 }
  0x42   :  { %v355_v32 = vmul.f32 %v354_v25, %v989_v0 }
  0x43   :  { %93 = vrot.lane.b32.xlu2 %v91_v42, %s943_s28  ;;  %v678_v42 = vstv %s1045_s0 }
  0x44   :  { %v679_v49 = vmul.f32 %v678_v42, %v989_v0 }
  0x46   :  { %v324_v21 = vstv %s869_s22  ;;  %s1120_s22 = sld [smem:[#allocation3 + $0x2f]] }
  0x47   :  { %449 = vrot.lane.b32.xlu1 %v447_v45, %s943_s28  ;;  %v325_v23 = vmul.f32 %v324_v21, %v989_v0  ;;  %v179_v21 = vmul.f32 %v178_v11, %v989_v0 }
  0x48   :  { %277 = vrot.lane.b32.xlu0 %v275_v46, %s943_s28 }
  0x4b   :  { %621 = vrot.lane.b32.xlu2 %v619_v48, %s943_s28  ;;  %s31_s28 = sld [smem:[#allocation3]]  ;;  %v221_v48 = vstv %s1047_s6 }
  0x4c   :  { %v222_v55 = vmul.f32 %v221_v48, %v989_v0 }
  0x4f   :  { %287 = vrot.lane.b32.xlu1 %v285_v51, %s944_s7 }
  0x50   :  { %104 = vrot.lane.b32.xlu0 %v102_v52, %s944_s7 }
  0x51   :  { %v32_v30 = vstv %s31_s28 }
  0x52   :  { %v33_v36 = vmul.f32 %v32_v30, %v989_v0 }
  0x53   :  { %459 = vrot.lane.b32.xlu2 %v457_v54, %s944_s7 }
  0x57   :  { %115 = vrot.lane.b32.xlu1 %v113_v57, %s945_s11 }
  0x58   :  { %631 = vrot.lane.b32.xlu0 %v629_v58, %s944_s7  ;;  %s1050_s7 = sld [smem:[#allocation3 + $0x1d]] }
  0x5b   :  { %297 = vrot.lane.b32.xlu2 %v295_v60, %s945_s11  ;;  %v565_v60 = vstv %s1058_s9 }
  0x5e   :  { %v344_v51 = vstv %s1050_s7 }
  0x5f   :  { %641 = vrot.lane.b32.xlu1 %v639_v63, %s945_s11  ;;  %v345_v59 = vmul.f32 %v344_v51, %v989_v0  ;;  %v536_v51 = vstv %s1120_s22 }
  0x60   :  { %469 = vrot.lane.b32.xlu0 %v467_v1, %s945_s11  ;;  %s1062_s11 = sld [smem:[#allocation3 + $0x2d]]  ;;  %v393_v1 = vstv %s1064_s12 }
  0x63   :  { %126 = vrot.lane.b32.xlu2 %v124_v3, %s946_s17 }
  0x66   :  { %v516_v63 = vstv %s1062_s11 }
  0x67   :  { %479 = vrot.lane.b32.xlu1 %v477_v6, %s946_s17  ;;  %v517_v8 = vmul.f32 %v516_v63, %v989_v0 }
  0x68   :  { %307 = vrot.lane.b32.xlu0 %v305_v7, %s946_s17  ;;  %v566_v7 = vmul.f32 %v565_v60, %v989_v0 }
  0x6b   :  { %651 = vrot.lane.b32.xlu2 %v649_v9, %s946_s17  ;;  %v394_v9 = vmul.f32 %v393_v1, %v989_v0  ;;  %s1099_s17 = sld [smem:[#allocation3 + $0x3e]] }
  0x6d   :  { %v50_v15 = vpop.permute.xlu2 %49 }
  0x6e   :  { %v51_v37 = vrot.slane %v50_v15, 2 }
  0x6f   :  { %317 = vrot.lane.b32.xlu1 %v315_v12, %s947_s23 }
  0x70   :  { %137 = vrot.lane.b32.xlu0 %v135_v13, %s947_s23  ;;  %v53_v46 = vsel %vm52_vm1, %v50_v15, %v51_v37  ;;  %v688_v15 = vstv %s1075_s14 }
  0x71   :  { %v689_v24 = vmul.f32 %v688_v15, %v989_v0 }
  0x73   :  { %489 = vrot.lane.b32.xlu2 %v487_v16, %s947_s23 }
  0x75   :  { %v1040_v22 = vpop.permute.xlu2 %237 }
  0x76   :  { %v239_v57 = vrot.slane %v1040_v22, 2 }
  0x77   :  { %148 = vrot.lane.b32.xlu1 %v146_v19, %s948_s27 }
  0x78   :  { %661 = vrot.lane.b32.xlu0 %v659_v20, %s947_s23  ;;  %v240_v6 = vsel %vm52_vm1, %v1040_v22, %v239_v57  ;;  %s1123_s23 = sld [smem:[#allocation3 + $0x1f]] }
  0x7b   :  { %327 = vrot.lane.b32.xlu2 %v325_v23, %s948_s27 }
  0x7d   :  { %v61_v29 = vpop.permute.xlu2 %60 }
  0x7e   :  { %v62_v39 = vrot.slane %v61_v29, 2  ;;  %v364_v53 = vstv %s1123_s23 }
  0x7f   :  { %671 = vrot.lane.b32.xlu1 %v669_v26, %s948_s27 }
  0x80   :  { %499 = vrot.lane.b32.xlu0 %v497_v27, %s948_s27  ;;  %v64_v47 = vsel %vm63_vm2, %v61_v29, %v62_v39 }
  0x81   :  { %v1052_v33 = vpop.permute.xlu1 %399 }
  0x82   :  { %v39_v35 = vpop.permute.xlu0 %38  ;;  %v401_v2 = vrot.slane %v1052_v33, 2 }
  0x83   :  { %v40_v38 = vrot.slane %v39_v35, 2  ;;  %159 = vrot.lane.b32.xlu2 %v157_v31, %s949_s10 }
  0x84   :  { %v402_v13 = vsel %vm41_vm0, %v1052_v33, %v401_v2  ;;  %v698_v33 = vstv %s1099_s17 }
  0x85   :  { %v42_v43 = vsel %vm41_vm0, %v39_v35, %v40_v38  ;;  %v592_v44 = vpop.permute.xlu2 %591  ;;  %v404_v22 = vadd.f32 %v402_v13, %v394_v9  ;;  %v526_v35 = vstv %s1104_s19 }
  0x86   :  { %v44_v45 = vadd.f32 %v42_v43, %v33_v36  ;;  %v593_v17 = vrot.slane %v592_v44, 2  ;;  %v527_v42 = vmul.f32 %v526_v35, %v989_v0  ;;  %v189_v43 = vstv %s1111_s20 }
  0x87   :  { %509 = vrot.lane.b32.xlu1 %v507_v40, %s949_s10  ;;  %v699_v40 = vmul.f32 %v698_v33, %v989_v0 }
  0x88   :  { %v55_v50 = vadd.f32 %v53_v46, %v44_v45  ;;  %337 = vrot.lane.b32.xlu0 %v335_v41, %s949_s10  ;;  %v594_v29 = vsel %vm63_vm2, %v592_v44, %v593_v17 }
  0x89   :  { %v572_v52 = vpop.permute.xlu1 %571 }
  0x8a   :  { %v1077_v54 = vadd.f32 %v64_v47, %v55_v50  ;;  %v228_v56 = vpop.permute.xlu0 %227  ;;  %v573_v61 = vrot.slane %v572_v52, 2  ;;  %v190_v50 = vmul.f32 %v189_v43, %v989_v0 }
  0x8b   :  { %v229_v58 = vrot.slane %v228_v56, 2  ;;  %681 = vrot.lane.b32.xlu2 %v679_v49, %s949_s10 }
  0x8c   :  { %v574_v10 = vsel %vm41_vm0, %v572_v52, %v573_v61  ;;  %v365_v61 = vmul.f32 %v364_v53, %v989_v0 }
  0x8d   :  { %v230_v3 = vsel %vm41_vm0, %v228_v56, %v229_v58  ;;  %v430_v4 = vpop.permute.xlu2 %429  ;;  %v576_v19 = vadd.f32 %v574_v10, %v566_v7 }
  0x8e   :  { %v232_v5 = vadd.f32 %v230_v3, %v222_v55  ;;  %v431_v37 = vrot.slane %v430_v4, 2 }
  0x8f   :  { %347 = vrot.lane.b32.xlu1 %v345_v59, %s950_s16  ;;  %v537_v59 = vmul.f32 %v536_v51, %v989_v0 }
  0x90   :  { %170 = vrot.lane.b32.xlu0 %v168_v62, %s950_s16  ;;  %v242_v12 = vadd.f32 %v240_v6, %v232_v5  ;;  %v432_v47 = vsel %vm74_vm3, %v430_v4, %v431_v37  ;;  %v708_v62 = vstv %s1129_s24 }
  0x91   :  { %v582_v14 = vpop.permute.xlu1 %581  ;;  %v709_v6 = vmul.f32 %v708_v62, %v989_v0 }
  0x92   :  { %v583_v16 = vrot.slane %v582_v14, 2  ;;  %v410_v18 = vpop.permute.xlu0 %409 }
  0x93   :  { %v411_v20 = vrot.slane %v410_v18, 2  ;;  %519 = vrot.lane.b32.xlu2 %v517_v8, %s950_s16 }
  0x94   :  { %v584_v23 = vsel %vm52_vm1, %v582_v14, %v583_v16 }
  0x95   :  { %v586_v26 = vadd.f32 %v584_v23, %v576_v19  ;;  %v412_v27 = vsel %vm52_vm1, %v410_v18, %v411_v20  ;;  %v268_v28 = vpop.permute.xlu2 %267 }
  0x96   :  { %v414_v30 = vadd.f32 %v412_v27, %v404_v22  ;;  %v269_v56 = vrot.slane %v268_v28, 2 }
  0x97   :  { %v1115_v31 = vadd.f32 %v594_v29, %v586_v26  ;;  %181 = vrot.lane.b32.xlu1 %v179_v21, %s951_s21 }
  0x98   :  { %691 = vrot.lane.b32.xlu0 %v689_v24, %s950_s16  ;;  %v270_v3 = vsel %vm85_vm4, %v268_v28, %v269_v56 }
  0x99   :  { %v420_v34 = vpop.permute.xlu1 %419 }
  0x9a   :  { %v421_v36 = vrot.slane %v420_v34, 2  ;;  %v248_v38 = vpop.permute.xlu0 %247 }
  0x9b   :  { %v249_v39 = vrot.slane %v248_v38, 2  ;;  %357 = vrot.lane.b32.xlu2 %v355_v32, %s951_s21 }
  0x9c   :  { %v422_v41 = vsel %vm63_vm2, %v420_v34, %v421_v36 }
  0x9d   :  { %v424_v44 = vadd.f32 %v422_v41, %v414_v30  ;;  %v250_v45 = vsel %vm63_vm2, %v248_v38, %v249_v39  ;;  %v94_v46 = vpop.permute.xlu2 %93  ;;  %vm776_vm2 = vcmask 392192  }
  0x9e   :  { %v252_v48 = vadd.f32 %v250_v45, %v242_v12  ;;  %v95_v9 = vrot.slane %v94_v46, 2 }
  0x9f   :  { %v434_v49 = vadd.f32 %v432_v47, %v424_v44  ;;  %701 = vrot.lane.b32.xlu1 %v699_v40, %s951_s21 }
  0xa0   :  { %529 = vrot.lane.b32.xlu0 %v527_v42, %s951_s21 }
  0xa1   :  { %v258_v52 = vpop.permute.xlu1 %257 }
  0xa2   :  { %v259_v55 = vrot.slane %v258_v52, 2  ;;  %v72_v57 = vpop.permute.xlu0 %71 }
  0xa3   :  { %v73_v58 = vrot.slane %v72_v57, 2  ;;  %192 = vrot.lane.b32.xlu2 %v190_v50, %s952_s25 }
  0xa4   :  { %v260_v60 = vsel %vm74_vm3, %v258_v52, %v259_v55 }
  0xa5   :  { %v262_v63 = vadd.f32 %v260_v60, %v252_v48  ;;  %v75_v1 = vsel %vm74_vm3, %v72_v57, %v73_v58  ;;  %v622_v2 = vpop.permute.xlu2 %621 }
  0xa6   :  { %v77_v4 = vadd.f32 %v75_v1, %v1077_v54  ;;  %v97_v54 = vsel %vm96_vm5, %v94_v46, %v95_v9  ;;  %v623_v19 = vrot.slane %v622_v2, 2 }
  0xa7   :  { %v272_v5 = vadd.f32 %v270_v3, %v262_v63  ;;  %539 = vrot.lane.b32.xlu1 %v537_v59, %s952_s25 }
  0xa8   :  { %367 = vrot.lane.b32.xlu0 %v365_v61, %s952_s25  ;;  %v624_v26 = vsel %vm96_vm5, %v622_v2, %v623_v19 }
  0xa9   :  { %v83_v7 = vpop.permute.xlu1 %82 }
  0xaa   :  { %v84_v8 = vrot.slane %v83_v7, 2  ;;  %v602_v10 = vpop.permute.xlu0 %601 }
  0xab   :  { %v603_v11 = vrot.slane %v602_v10, 2  ;;  %711 = vrot.lane.b32.xlu2 %v709_v6, %s952_s25 }
  0xac   :  { %v86_v12 = vsel %vm85_vm4, %v83_v7, %v84_v8 }
  0xad   :  { %v88_v13 = vadd.f32 %v86_v12, %v77_v4  ;;  %v604_v14 = vsel %vm74_vm3, %v602_v10, %v603_v11  ;;  %v460_v15 = vpop.permute.xlu2 %459 }
  0xae   :  { %v606_v16 = vadd.f32 %v604_v14, %v1115_v31  ;;  %v461_v31 = vrot.slane %v460_v15, 2 }
  0xaf   :  { %v99_v17 = vadd.f32 %v97_v54, %v88_v13 }
  0xb0   :  { %v462_v38 = vsel %vm107_vm6, %v460_v15, %v461_v31 }
  0xb1   :  { %v612_v0 = vpop.permute.xlu1 %611 }
  0xb2   :  { %v613_v18 = vrot.slane %v612_v0, 2  ;;  %v440_v20 = vpop.permute.xlu0 %439 }
  0xb3   :  { %v441_v21 = vrot.slane %v440_v20, 2 }
  0xb4   :  { %v614_v22 = vsel %vm85_vm4, %v612_v0, %v613_v18 }
  0xb5   :  { %v616_v23 = vadd.f32 %v614_v22, %v606_v16  ;;  %v442_v24 = vsel %vm85_vm4, %v440_v20, %v441_v21  ;;  %v298_v25 = vpop.permute.xlu2 %297 }
  0xb6   :  { %v444_v27 = vadd.f32 %v442_v24, %v434_v49  ;;  %v299_v43 = vrot.slane %v298_v25, 2 }
  0xb7   :  { %v1151_v28 = vadd.f32 %v624_v26, %v616_v23 }
  0xb8   :  { %v300_v48 = vsel %vm118_vm7, %v298_v25, %v299_v43 }
  0xb9   :  { %v450_v29 = vpop.permute.xlu1 %449 }
  0xba   :  { %v451_v30 = vrot.slane %v450_v29, 2  ;;  %v278_v32 = vpop.permute.xlu0 %277 }
  0xbb   :  { %v279_v33 = vrot.slane %v278_v32, 2 }
  0xbc   :  { %v452_v34 = vsel %vm96_vm5, %v450_v29, %v451_v30 }
  0xbd   :  { %v454_v35 = vadd.f32 %v452_v34, %v444_v27  ;;  %v280_v36 = vsel %vm96_vm5, %v278_v32, %v279_v33  ;;  %v127_v37 = vpop.permute.xlu2 %126 }
  0xbe   :  { %v282_v39 = vadd.f32 %v280_v36, %v272_v5  ;;  %v128_v13 = vrot.slane %v127_v37, 2 }
  0xbf   :  { %v1156_v40 = vadd.f32 %v462_v38, %v454_v35 }
  0xc0   :  { %v130_v18 = vsel %vm129_vm8, %v127_v37, %v128_v13 }
  0xc1   :  { %v288_v41 = vpop.permute.xlu1 %287 }
  0xc2   :  { %v289_v42 = vrot.slane %v288_v41, 2  ;;  %v105_v44 = vpop.permute.xlu0 %104 }
  0xc3   :  { %v106_v5 = vrot.slane %v105_v44, 2 }
  0xc4   :  { %v290_v45 = vsel %vm107_vm6, %v288_v41, %v289_v42 }
  0xc5   :  { %v292_v46 = vadd.f32 %v290_v45, %v282_v39  ;;  %v652_v47 = vpop.permute.xlu2 %651  ;;  %v108_v7 = vsel %vm107_vm6, %v105_v44, %v106_v5 }
  0xc6   :  { %v110_v11 = vadd.f32 %v108_v7, %v99_v17  ;;  %v653_v27 = vrot.slane %v652_v47, 2 }
  0xc7   :  { %v1160_v49 = vadd.f32 %v300_v48, %v292_v46 }
  0xc8   :  { %v654_v41 = vsel %vm129_vm8, %v652_v47, %v653_v27 }
  0xc9   :  { %v116_v50 = vpop.permute.xlu1 %115 }
  0xca   :  { %v632_v51 = vpop.permute.xlu0 %631  ;;  %v117_v6 = vrot.slane %v116_v50, 2 }
  0xcb   :  { %v633_v14 = vrot.slane %v632_v51, 2 }
  0xcc   :  { %v119_v9 = vsel %vm118_vm7, %v116_v50, %v117_v6 }
  0xcd   :  { %v1162_v52 = vpop.permute.xlu2 %489  ;;  %v121_v54 = vadd.f32 %v119_v9, %v110_v11  ;;  %v634_v19 = vsel %vm107_vm6, %v632_v51, %v633_v14 }
  0xce   :  { %v636_v26 = vadd.f32 %v634_v19, %v1151_v28  ;;  %v491_v42 = vrot.slane %v1162_v52, 2 }
  0xcf   :  { %v132_v21 = vadd.f32 %v130_v18, %v121_v54 }
  0xd1   :  { %v642_v53 = vpop.permute.xlu1 %641 }
  0xd2   :  { %v470_v55 = vpop.permute.xlu0 %469  ;;  %v643_v16 = vrot.slane %v642_v53, 2 }
  0xd3   :  { %v471_v22 = vrot.slane %v470_v55, 2 }
  0xd4   :  { %v644_v23 = vsel %vm118_vm7, %v642_v53, %v643_v16  ;;  %v492_v16 = vsel %vm140_vm9, %v1162_v52, %v491_v42 }
  0xd5   :  { %v1164_v56 = vpop.permute.xlu2 %327  ;;  %v646_v33 = vadd.f32 %v644_v23, %v636_v26  ;;  %v472_v34 = vsel %vm118_vm7, %v470_v55, %v471_v22 }
  0xd6   :  { %v474_v28 = vadd.f32 %v472_v34, %v1156_v40  ;;  %v329_v14 = vrot.slane %v1164_v56, 2 }
  0xd7   :  { %v656_v46 = vadd.f32 %v654_v41, %v646_v33 }
  0xd8   :  { %v330_v26 = vsel %vm151_vm10, %v1164_v56, %v329_v14 }
  0xd9   :  { %v480_v57 = vpop.permute.xlu1 %479 }
  0xda   :  { %v1166_v58 = vpop.permute.xlu0 %307  ;;  %v481_v35 = vrot.slane %v480_v57, 2 }
  0xdb   :  { %v309_v38 = vrot.slane %v1166_v58, 2 }
  0xdc   :  { %v482_v48 = vsel %vm129_vm8, %v480_v57, %v481_v35 }
  0xdd   :  { %v160_v59 = vpop.permute.xlu2 %159  ;;  %v310_v47 = vsel %vm129_vm8, %v1166_v58, %v309_v38  ;;  %v484_v9 = vadd.f32 %v482_v48, %v474_v28 }
  0xde   :  { %v161_v30 = vrot.slane %v160_v59, 2  ;;  %v312_v13 = vadd.f32 %v310_v47, %v1160_v49 }
  0xdf   :  { %v494_v22 = vadd.f32 %v492_v16, %v484_v9 }
  0xe0   :  { %v163_v43 = vsel %vm162_vm11, %v160_v59, %v161_v30 }
  0xe1   :  { %v1168_v60 = vpop.permute.xlu1 %317 }
  0xe2   :  { %v138_v61 = vpop.permute.xlu0 %137  ;;  %v319_v50 = vrot.slane %v1168_v60, 2 }
  0xe3   :  { %v139_v15 = vrot.slane %v138_v61, 2 }
  0xe4   :  { %v320_v58 = vsel %vm140_vm9, %v1168_v60, %v319_v50 }
  0xe5   :  { %v1170_v62 = vpop.permute.xlu2 %681  ;;  %v141_v20 = vsel %vm140_vm9, %v138_v61, %v139_v15 }
  0xe6   :  { %v143_v29 = vadd.f32 %v141_v20, %v132_v21  ;;  %v683_v5 = vrot.slane %v1170_v62, 2  ;;  %v322_v20 = vadd.f32 %v320_v58, %v312_v13 }
  0xe8   :  { %v684_v60 = vsel %vm162_vm11, %v1170_v62, %v683_v5  ;;  %v332_v33 = vadd.f32 %v330_v26, %v322_v20  ;;  %v753_v20 = vld [vmem:[%s1386_s2 + $0x68] sm:$0xff]  ;;  %v760_v26 = vld [vmem:[%s1386_s2 + $0xa0] sm:$0xff] }
  0xe9   :  { %v149_v63 = vpop.permute.xlu1 %148 }
  0xea   :  { %v662_v1 = vpop.permute.xlu0 %661  ;;  %v150_v0 = vrot.slane %v149_v63, 2 }
  0xeb   :  { %v663_v31 = vrot.slane %v662_v1, 2 }
  0xec   :  { %v152_v24 = vsel %vm151_vm10, %v149_v63, %v150_v0 }
  0xed   :  { %v1172_v3 = vpop.permute.xlu2 %519  ;;  %v154_v36 = vadd.f32 %v152_v24, %v143_v29  ;;  %v664_v44 = vsel %vm140_vm9, %v662_v1, %v663_v31 }
  0xee   :  { %v666_v59 = vadd.f32 %v664_v44, %v656_v46  ;;  %v521_v56 = vrot.slane %v1172_v3, 2 }
  0xef   :  { %v165_v51 = vadd.f32 %v163_v43, %v154_v36 }
  0xf0   :  { %v522_v42 = vsel %vm173_vm12, %v1172_v3, %v521_v56 }
  0xf1   :  { %v672_v2 = vpop.permute.xlu1 %671 }
  0xf2   :  { %v1174_v4 = vpop.permute.xlu0 %499  ;;  %v673_v39 = vrot.slane %v672_v2, 2 }
  0xf3   :  { %v501_v57 = vrot.slane %v1174_v4, 2 }
  0xf4   :  { %v674_v55 = vsel %vm151_vm10, %v672_v2, %v673_v39 }
  0xf5   :  { %v1182_v12 = vpop.permute.xlu2 %357  ;;  %v676_v11 = vadd.f32 %v674_v55, %v666_v59  ;;  %v502_v49 = vsel %vm151_vm10, %v1174_v4, %v501_v57 }
  0xf6   :  { %v504_v30 = vadd.f32 %v502_v49, %v494_v22  ;;  %v359_v39 = vrot.slane %v1182_v12, 2  ;;  %v751_v49 = vld [vmem:[%s1386_s2 + $0x58] sm:$0xff]  ;;  %v749_v22 = vld [vmem:[%s1386_s2 + $0x48] sm:$0xff] }
  0xf7   :  { %v686_v23 = vadd.f32 %v684_v60, %v676_v11  ;;  %v752_v60 = vld [vmem:[%s1386_s2 + $0x60] sm:$0xff] }
  0xf8   :  { %v360_v50 = vsel %vm184_vm13, %v1182_v12, %v359_v39 }
  0xf9   :  { %v1177_v8 = vpop.permute.xlu1 %509 }
  0xfa   :  { %v1180_v10 = vpop.permute.xlu0 %337  ;;  %v511_v15 = vrot.slane %v1177_v8, 2 }
  0xfb   :  { %v339_v0 = vrot.slane %v1180_v10, 2 }
  0xfc   :  { %v512_v62 = vsel %vm162_vm11, %v1177_v8, %v511_v15 }
  0xfd   :  { %v193_v37 = vpop.permute.xlu2 %192  ;;  %v340_v31 = vsel %vm162_vm11, %v1180_v10, %v339_v0  ;;  %v514_v35 = vadd.f32 %v512_v62, %v504_v30  ;;  %v745_v62 = vld [vmem:[%s1386_s2 + $0x28] sm:$0xff]  ;;  %v743_v30 = vld [vmem:[%s1386_s2 + $0x18] sm:$0xff] }
  0xfe   :  { %v194_v40 = vrot.slane %v193_v37, 2  ;;  %v342_v38 = vadd.f32 %v340_v31, %v332_v33  ;;  %v757_v31 = vld [vmem:[%s1386_s2 + $0x88] sm:$0xff] }
  0xff   :  { %v524_v44 = vadd.f32 %v522_v42, %v514_v35  ;;  %v740_v42 = vld [vmem:[%s1386_s2] sm:$0xff] }
 0x100   :  { %v196_v54 = vsel %vm195_vm14, %v193_v37, %v194_v40 }
 0x101   :  { %v1187_v17 = vpop.permute.xlu1 %347 }
 0x102   :  { %v171_v25 = vpop.permute.xlu0 %170  ;;  %v349_v24 = vrot.slane %v1187_v17, 2 }
 0x103   :  { %v172_v32 = vrot.slane %v171_v25, 2 }
 0x104   :  { %v350_v36 = vsel %vm173_vm12, %v1187_v17, %v349_v24  ;;  %v747_v24 = vld [vmem:[%s1386_s2 + $0x38] sm:$0xff] }
 0x105   :  { %v174_v45 = vsel %vm173_vm12, %v171_v25, %v172_v32  ;;  %v712_v19 = vpop.permute.xlu2 %711  ;;  %v352_v28 = vadd.f32 %v350_v36, %v342_v38  ;;  %v741_v38 = vld [vmem:[%s1386_s2 + $0x8] sm:$0xff] }
 0x106   :  { %v176_v1 = vadd.f32 %v174_v45, %v165_v51  ;;  %v713_v4 = vrot.slane %v712_v19, 2 }
 0x107   :  { %v362_v3 = vadd.f32 %v360_v50, %v352_v28 }
 0x108   :  { %v714_v10 = vsel %vm195_vm14, %v712_v19, %v713_v4  ;;  %v754_v19 = vld [vmem:[%s1386_s2 + $0x70] sm:$0xff]  ;;  %v744_v4 = vld [vmem:[%s1386_s2 + $0x20] sm:$0xff] }
 0x109   :  { %v182_v53 = vpop.permute.xlu1 %181 }
 0x10a   :  { %v183_v61 = vrot.slane %v182_v53, 2  ;;  %v692_v63 = vpop.permute.xlu0 %691 }
 0x10b   :  { %v693_v7 = vrot.slane %v692_v63, 2 }
 0x10c   :  { %v185_v6 = vsel %vm184_vm13, %v182_v53, %v183_v61 }
 0x10d   :  { %v187_v2 = vadd.f32 %v185_v6, %v176_v1  ;;  %v694_v21 = vsel %vm173_vm12, %v692_v63, %v693_v7 }
 0x10e   :  { %v696_v32 = vadd.f32 %v694_v21, %v686_v23  ;;  %v750_v21 = vld [vmem:[%s1386_s2 + $0x50] sm:$0xff]  ;;  %v748_v23 = vld [vmem:[%s1386_s2 + $0x40] sm:$0xff] }
 0x10f   :  { %v198_v18 = vadd.f32 %v196_v54, %v187_v2 }
 0x111   :  { %199 = vst [vmem:[%s1387_s3] sm:$0xf] %v198_v18  ;;  %v702_v52 = vpop.permute.xlu1 %701  ;;  %v200_v25 = vmax.f32 %v198_v18, 0.0  ;;  %v755_v18 = vld [vmem:[%s1386_s2 + $0x78] sm:$0xff] }
 0x112   :  { %v703_v27 = vrot.slane %v702_v52, 2  ;;  %v530_v29 = vpop.permute.xlu0 %529  ;;  %779 = vmatpush.msra.mxu0 %v755_v18 }
 0x113   :  { %203 = vrot.lane.b32.xlu0 %v200_v25, %s938_s29  ;;  %201 = vst [vmem:[%s1388_s4] sm:$0xf] %v200_v25  ;;  %v531_v8 = vrot.slane %v530_v29, 2 }
 0x114   :  { %v704_v34 = vsel %vm184_vm13, %v702_v52, %v703_v27  ;;  %780 = vmatpush.msra.mxu0 %v754_v19  ;;  %v746_v52 = vld [vmem:[%s1386_s2 + $0x30] sm:$0xff]  ;;  %v759_v27 = vld [vmem:[%s1386_s2 + $0x98] sm:$0xff] }
 0x115   :  { %v706_v37 = vadd.f32 %v704_v34, %v696_v32  ;;  %v532_v43 = vsel %vm184_vm13, %v530_v29, %v531_v8  ;;  %v758_v29 = vld [vmem:[%s1386_s2 + $0x90] sm:$0xff]  ;;  %v756_v8 = vld [vmem:[%s1386_s2 + $0x80] sm:$0xff] }
 0x116   :  { %v534_v51 = vadd.f32 %v532_v43, %v524_v44  ;;  %781 = vmatpush.msra.mxu0 %v753_v20  ;;  %v742_v34 = vld [vmem:[%s1386_s2 + $0x10] sm:$0xff] }
 0x117   :  { %v716_v41 = vadd.f32 %v714_v10, %v706_v37 }
 0x118   :  { %782 = vmatpush.msra.mxu0 %v752_v60 }
 0x119   :  { %717 = vst [vmem:[%s1387_s3 + $0xc] sm:$0xf] %v716_v41  ;;  %v540_v45 = vpop.permute.xlu1 %539  ;;  %v718_v17 = vmax.f32 %v716_v41, 0.0 }
 0x11a   :  { %v541_v46 = vrot.slane %v540_v45, 2  ;;  %v368_v48 = vpop.permute.xlu0 %367  ;;  %783 = vmatpush.msra.mxu0 %v751_v49 }
 0x11b   :  { %v369_v53 = vrot.slane %v368_v48, 2  ;;  %719 = vst [vmem:[%s1388_s4 + $0xc] sm:$0xf] %v718_v17  ;;  %721 = vrot.lane.b32.xlu0 %v718_v17, %s938_s29 }
 0x11c   :  { %v542_v47 = vsel %vm195_vm14, %v540_v45, %v541_v46  ;;  %784 = vmatpush.msra.mxu0 %v750_v21 }
 0x11d   :  { %v544_v55 = vadd.f32 %v542_v47, %v534_v51  ;;  %v370_v61 = vsel %vm195_vm14, %v368_v48, %v369_v53 }
 0x11e   :  { %v372_v40 = vadd.f32 %v370_v61, %v362_v3  ;;  %785 = vmatpush.msra.mxu0 %v749_v22 }
 0x11f   :  { %545 = vst [vmem:[%s1387_s3 + $0x8] sm:$0xf] %v544_v55  ;;  %v546_v12 = vmax.f32 %v544_v55, 0.0 }
 0x120   :  { %373 = vst [vmem:[%s1387_s3 + $0x4] sm:$0xf] %v372_v40  ;;  %v374_v63 = vmax.f32 %v372_v40, 0.0  ;;  %786 = vmatpush.msra.mxu0 %v748_v23 }
 0x121   :  { %549 = vrot.lane.b32.xlu2 %v546_v12, %s938_s29  ;;  %547 = vst [vmem:[%s1388_s4 + $0x8] sm:$0xf] %v546_v12 }
 0x122   :  { %377 = vrot.lane.b32.xlu1 %v374_v63, %s938_s29  ;;  %375 = vst [vmem:[%s1388_s4 + $0x4] sm:$0xf] %v374_v63  ;;  %787 = vmatpush.msra.mxu0 %v747_v24 }
 0x124   :  { %788 = vmatpush.msra.mxu0 %v746_v52 }
 0x126   :  { %789 = vmatpush.msra.mxu0 %v745_v62 }
 0x128   :  { %790 = vmatpush.msra.mxu0 %v744_v4 }
 0x12a   :  { %791 = vmatpush.msra.mxu0 %v743_v30 }
 0x12c   :  { %792 = vmatpush.msra.mxu0 %v742_v34 }
 0x12e   :  { %793 = vmatpush.msra.mxu0 %v741_v38 }
 0x130   :  { %794 = vmatpush.msra.mxu0 %v740_v42 }
 0x17b   :  { %v550_v59 = vpop.permute.xlu2 %549 }
 0x17c   :  { %v551_v1 = vrot.slane %v550_v59, 2 }
 0x17e   :  { %v552_v5 = vsel %vm41_vm0, %v550_v59, %v551_v1 }
 0x17f   :  { %v1271_v57 = vmax.f32 %v546_v12, %v552_v5 }
 0x181   :  { %556 = vrot.lane.b32.xlu0 %v1271_v57, %s941_s18 }
 0x185   :  { %v204_v6 = vpop.permute.xlu0 %203 }
 0x186   :  { %v205_v7 = vrot.slane %v204_v6, 2 }
 0x188   :  { %v206_v9 = vsel %vm41_vm0, %v204_v6, %v205_v7 }
 0x189   :  { %v1276_v58 = vmax.f32 %v200_v25, %v206_v9  ;;  %v761_v25 = vld [vmem:[%s1386_s2 + $0xa8] sm:$0xff] }
 0x18a   :  { %809 = vmatpush.msra.mxu1 %v761_v25 }
 0x18b   :  { %210 = vrot.lane.b32.xlu1 %v1276_v58, %s941_s18 }
 0x18c   :  { %810 = vmatpush.msra.mxu1 %v760_v26 }
 0x18d   :  { %v722_v11 = vpop.permute.xlu0 %721 }
 0x18e   :  { %v723_v2 = vrot.slane %v722_v11, 2  ;;  %811 = vmatpush.msra.mxu1 %v759_v27 }
 0x190   :  { %v724_v13 = vsel %vm41_vm0, %v722_v11, %v723_v2  ;;  %812 = vmatpush.msra.mxu1 %v758_v29 }
 0x191   :  { %v1281_v14 = vmax.f32 %v718_v17, %v724_v13 }
 0x192   :  { %813 = vmatpush.msra.mxu1 %v757_v31 }
 0x193   :  { %728 = vrot.lane.b32.xlu1 %v1281_v14, %s941_s18 }
 0x194   :  { %v378_v15 = vpop.permute.xlu1 %377  ;;  %814 = vmatpush.msra.mxu1 %v756_v8 }
 0x195   :  { %v379_v54 = vrot.slane %v378_v15, 2 }
 0x197   :  { %v380_v16 = vsel %vm41_vm0, %v378_v15, %v379_v54  ;;  %vm217_vm0 = vcmask 388098  }
 0x198   :  { %v382_v0 = vmax.f32 %v374_v63, %v380_v16  ;;  %vm1347_vm1 = vmor %vm217_vm0, %vm216_vm15 }
 0x19a   :  { %384 = vrot.lane.b32.xlu2 %v382_v0, %s941_s18 }
 0x1f3   :  { %v557_v32 = vpop.permute.xlu0 %556 }
 0x1f4   :  { %v385_v33 = vpop.permute.xlu2 %384  ;;  %v558_v56 = vrot.slane %v557_v32, 2 }
 0x1f5   :  { %v386_v35 = vrot.slane %v385_v33, 2 }
 0x1f6   :  { %v559_v37 = vsel %vm74_vm3, %v557_v32, %v558_v56 }
 0x1f7   :  { %v387_v10 = vsel %vm74_vm3, %v385_v33, %v386_v35  ;;  %v561_v39 = vmax.f32 %v1271_v57, %v559_v37 }
 0x1f8   :  { %v389_v41 = vmax.f32 %v382_v0, %v387_v10 }
 0x1f9   :  { %563 = vst.msk [vmem:[#allocation2 + $0x8] sm:$0xf] %vm1347_vm1, %v561_v39 }
 0x1fa   :  { %391 = vst.msk [vmem:[#allocation2 + $0x4] sm:$0xf] %vm1347_vm1, %v389_v41 }
 0x1fd   :  { %v211_v28 = vpop.permute.xlu1 %210 }
 0x1fe   :  { %v212_v43 = vrot.slane %v211_v28, 2 }
 0x200   :  { %v213_v44 = vsel %vm74_vm3, %v211_v28, %v212_v43  ;;  %v738_v45 = vld [vmem:[#allocation2 + $0x8] sm:$0xf] }
 0x201   :  { %v215_v17 = vmax.f32 %v1276_v58, %v213_v44  ;;  %v737_v46 = vld [vmem:[#allocation2 + $0x4] sm:$0xf]  ;;  %770 = vst [vmem:[#allocation1 + $0x2] ss:$4 sm:$0xff] %v738_v45 }
 0x202   :  { %768 = vst [vmem:[#allocation1 + $0x1] ss:$4 sm:$0xff] %v737_v46 }
 0x203   :  { %219 = vst.msk [vmem:[#allocation2] sm:$0xf] %vm1347_vm1, %v215_v17 }
 0x205   :  { %v729_v48 = vpop.permute.xlu1 %728 }
 0x206   :  { %v730_v50 = vrot.slane %v729_v48, 2 }
 0x208   :  { %v731_v51 = vsel %vm74_vm3, %v729_v48, %v730_v50 }
 0x209   :  { %v733_v53 = vmax.f32 %v1281_v14, %v731_v51 }
 0x20a   :  { %v736_v3 = vld [vmem:[#allocation2] sm:$0xf] }
 0x20b   :  { %735 = vst.msk [vmem:[#allocation2 + $0xc] sm:$0xf] %vm1347_vm1, %v733_v53 }
 0x20c   :  { %766 = vst [vmem:[#allocation1] ss:$4 sm:$0xff] %v736_v3 }
 0x212   :  { %v739_v47 = vld [vmem:[#allocation2 + $0xc] sm:$0xf] }
 0x213   :  { %772 = vst [vmem:[#allocation1 + $0x3] ss:$4 sm:$0xff] %v739_v47 }
 0x21a   :  { %v773_v55 = vld.sshfl [vmem:[#allocation1] sm:$0xff pattern:$0x73625140]  ;;  %v774_v61 = vld.sshfl [vmem:[#allocation1 + $0x8] sm:$0xff pattern:$0x73625140] }
 0x21b   :  { %795 = vmatmul.f32.vlgmr.msra.gmra.mxu0 %v773_v55  ;;  %906 = vmatmul.msk.f32.vlgmr.msra.gmra.mxu1 %vm776_vm2, %v774_v61 }
 0x298   :  { %v796_v40 = vpop.f32.mrf.mxu0  ;;  %v816_v12 = vpop.f32.mrf.mxu1 }
 0x299   :  { %v817_v63 = vadd.f32 %v816_v12, %v796_v40 }
 0x29b   :  { %v820_v59 = vrot.slane %v817_v63, 2  ;;  %v821_v1 = vrot.slane %v817_v63, 4  ;;  %v822_v5 = vrot.slane %v817_v63, 6  ;;  %826 = vst [vmem:[%s1389_s5] sm:$0x3] %v817_v63 }
 0x29d   :  { %827 = vst [vmem:[%s1389_s5 + $0x2] sm:$0x3] %v820_v59 }
 0x29e   :  { %828 = vst [vmem:[%s1389_s5 + $0x4] sm:$0x3] %v821_v1 }
 0x29f   :  { %829 = vst [vmem:[%s1389_s5 + $0x6] sm:$0x3] %v822_v5 }
 0x2a0   :  { %842 = vsyncpa [#allocation4], 1 }

</bundles_post_ra>
